<compile_context>
chip_gen: v7x
topology: tpu7x:2x2x1
jax: 0.10.0
libtpu: 0.0.40
codegen_flags: <defaults>
</compile_context>

<pallas_src>
import functools

import jax
import jax.numpy as jnp
from jax import lax
from jax.experimental import pallas as pl
from jax.experimental.pallas import tpu as pltpu

LANE = 128


def _round_up(x, m):
    return ((x + m - 1) // m) * m


# ----------------------------------------------------------------------------
# Fused Pallas kernel: MLP -> L2 normalize -> RBF(pairwise distance)
# ----------------------------------------------------------------------------
def _fused_pointdist_kernel(*refs, n_layers, sigma):
    x_ref = refs[0]
    wb = refs[1:1 + 2 * n_layers]          # interleaved (w_bf16, b_f32) refs
    k_ref = refs[1 + 2 * n_layers]         # (Mp, Mp) RBF kernel output
    f_ref = refs[2 + 2 * n_layers]         # (Mp, Dp) normalized features

    # ---- MLP: bf16 MXU matmuls, f32 accumulate, f32 bias/ReLU epilogue ----
    # (epilogue stays f32: v5e has no bf16 VPU/EUP path)
    h = x_ref[...]                          # (Mp, in_ch) f32, true K (no pad)
    for li in range(n_layers):
        w = wb[2 * li][...]                 # (K, N) bf16
        b = wb[2 * li + 1][...]             # (1, N) f32
        acc = jnp.dot(h.astype(jnp.bfloat16), w,
                      preferred_element_type=jnp.float32)
        acc = acc + b
        h = jnp.maximum(acc, 0.0) if li < n_layers - 1 else acc

    # ---- F.normalize(dim=-1): rsqrt + multiply (padded feature cols are 0) --
    sumsq = jnp.sum(h * h, axis=-1, keepdims=True)
    inv = lax.rsqrt(jnp.maximum(sumsq, 1e-24))   # == 1 / max(||h||, 1e-12)
    f = h * inv

    # ---- pairwise Euclidean distance on the MXU (f32 gram, no transpose) ----
    # d^2_ij = n_i + n_j - 2 * f_i . f_j, norms taken from diag(g) so the
    # diagonal is exactly 0 (matches torch.cdist with
    # compute_mode='donot_use_mm_for_euclid_dist' on the diagonal).
    g = lax.dot_general(f, f, dimension_numbers=(((1,), (1,)), ((), ())),
                        preferred_element_type=jnp.float32)       # (Mp, Mp)
    mp = g.shape[0]
    rid = lax.broadcasted_iota(jnp.int32, (mp, mp), 0)
    cid = lax.broadcasted_iota(jnp.int32, (mp, mp), 1)
    gd = jnp.where(rid == cid, g, 0.0)
    n_col = jnp.sum(gd, axis=0, keepdims=True)    # diag(g) as a (1, Mp) row
    n_row = jnp.transpose(n_col)                  # (Mp, 1) column
    d = jnp.sqrt(jnp.maximum(n_row + n_col - 2.0 * g, 0.0))

    # Matches torch.exp(-pairwise_dist / 2 * rbf_sigma ** 2) exactly
    # (i.e. -(d * sigma^2) / 2, as written in the reference).
    k_ref[...] = jnp.exp(-d / 2.0 * (sigma ** 2))
    f_ref[...] = f


# ----------------------------------------------------------------------------
# One-time weight prep (done at init, NOT per call)
# ----------------------------------------------------------------------------
def prepare_point_mlp_params(params, lane=LANE):
    """Pad the last layer's output dim to a lane multiple, cast weights to
    bf16, and reshape biases to (1, N) f32. Call once at init."""
    n_layers = len(params)
    prepped = []
    for li, (w, b) in enumerate(params):
        dout = w.shape[1]
        pad_out = (_round_up(dout, lane) - dout) if li == n_layers - 1 else 0
        wp = jnp.pad(w, ((0, 0), (0, pad_out))).astype(jnp.bfloat16)
        bp = jnp.pad(b, (0, pad_out)).reshape(1, -1).astype(jnp.float32)
        prepped.append((wp, bp))
    return prepped


# ----------------------------------------------------------------------------
# Wrapper: single fused pallas_call
# ----------------------------------------------------------------------------
def fused_point_mlp_rbf(feats, prepped_params, out_dim, *, rbf_sigma=1.0):
    """feats: (M, in_ch) f32; prepped_params: list of (w bf16, b (1,N) f32)."""
    M, in_ch = feats.shape
    n_layers = len(prepped_params)
    Dp = prepped_params[-1][0].shape[1]      # lane-padded feature output dim

    Mp = _round_up(M, LANE)                  # lane-dense (Mp, Mp) gram output

    # Only the row (M) dim is padded; the K=in_ch contraction dim stays true.
    x = jnp.pad(feats.astype(jnp.float32), ((0, Mp - M), (0, 0)))

    args = [x]
    in_specs = [pl.BlockSpec((Mp, in_ch), lambda i: (0, 0))]
    for (w, b) in prepped_params:
        args.extend([w, b])
        in_specs.append(pl.BlockSpec(w.shape, lambda i: (0, 0)))
        in_specs.append(pl.BlockSpec(b.shape, lambda i: (0, 0)))

    kernel = functools.partial(_fused_pointdist_kernel,
                               n_layers=n_layers, sigma=rbf_sigma)
    outer_p, feat_p = pl.pallas_call(
        kernel,
        out_shape=(jax.ShapeDtypeStruct((Mp, Mp), jnp.float32),
                   jax.ShapeDtypeStruct((Mp, Dp), jnp.float32)),
        grid=(1,),
        in_specs=in_specs,
        out_specs=(pl.BlockSpec((Mp, Mp), lambda i: (0, 0)),
                   pl.BlockSpec((Mp, Dp), lambda i: (0, 0))),
        compiler_params=pltpu.CompilerParams(
            dimension_semantics=("arbitrary",),
            # Explicit scoped-VMEM budget: full-array blocks scale as Mp^2;
            # tile the gram before M exceeds ~1-2K points (v7x has 64 MiB).
            vmem_limit_bytes=32 * 1024 * 1024),
    )(*args)

    return outer_p[:M, :M], feat_p[:M, :out_dim]


# ----------------------------------------------------------------------------
# Parameter setup (deterministic, in-script)
# ----------------------------------------------------------------------------
def init_point_transformer_params(key, in_ch, hidden=(256, 256, 128, 128),
                                  out_dim=64):
    dims = (in_ch,) + tuple(hidden) + (out_dim,)
    params = []
    for din, dout in zip(dims[:-1], dims[1:]):
        key, wk = jax.random.split(key)
        w = jax.random.normal(wk, (din, dout), jnp.float32) * (1.0 / jnp.sqrt(din))
        b = jnp.zeros((dout,), jnp.float32)
        params.append((w, b))
    return params


# ----------------------------------------------------------------------------
# Forward pass (glue in plain JAX, all heavy work in the single fused kernel)
# ----------------------------------------------------------------------------
def point_distance_kernel_forward(in_ref_xyz, in_ref_feats, prepped_params,
                                  out_dim, move_to_origin=True):
    """
    Args:
      in_ref_xyz:   (M, 3) float32
      in_ref_feats: (1, M, C) float32  (concatenated with xyz -> in_ch = C + 3)
    Returns:
      (outer_product (M, M), out_feat (M, 64))
    """
    r_xyz = in_ref_xyz
    if move_to_origin:
        # TODO(synk): move_to_origin / normalize_3dpts bodies are not provided in
        # the reference; assume centroid subtraction + scaling by max point norm.
        r_xyz = r_xyz - jnp.mean(r_xyz, axis=0, keepdims=True)
        max_norm = jnp.max(jnp.sqrt(jnp.sum(r_xyz * r_xyz, axis=-1)))
        r_xyz = r_xyz / jnp.maximum(max_norm, 1e-12)

    # torch.cat([in_ref_feats, r_xyz.unsqueeze(0)], dim=-1) -> (M, C + 3)
    feats = jnp.concatenate([in_ref_feats[0], r_xyz], axis=-1)

    # TODO(synk): BasePointTransformer architecture is not provided; stand-in is
    # a deterministic MLP with its declared dims [in_ch,256,256,128,128] -> 64,
    # fused with normalize + RBF in a single Pallas kernel.
    return fused_point_mlp_rbf(feats, prepped_params, out_dim, rbf_sigma=1.0)


# ----------------------------------------------------------------------------
if __name__ == "__main__":
    key = jax.random.PRNGKey(0)
    k_xyz, k_feat = jax.random.split(key)

    M = 64         # number of points
    C = 29         # input point-feature channels
    in_ch = C + 3  # = 32, channels fed into the (stand-in) point transformer
    OUT_DIM = 64

    in_ref_xyz = jax.random.normal(k_xyz, (M, 3), jnp.float32)
    in_ref_feats = jax.random.normal(k_feat, (1, M, C), jnp.float32)

    raw_params = init_point_transformer_params(jax.random.PRNGKey(42), in_ch,
                                               out_dim=OUT_DIM)
    # One-time prep (pad last layer, bf16 cast, bias reshape) — done at init.
    prepped_params = prepare_point_mlp_params(raw_params)
    prepped_params = jax.block_until_ready(
        jax.tree_util.tree_map(jnp.asarray, prepped_params))

    fwd = jax.jit(functools.partial(point_distance_kernel_forward,
                                    out_dim=OUT_DIM, move_to_origin=True))
    outer_product, out_feat = fwd(in_ref_xyz, in_ref_feats, prepped_params)
    jax.block_until_ready((outer_product, out_feat))

    assert outer_product.shape == (M, M)
    assert out_feat.shape == (M, OUT_DIM)

    # diagonal of exp(-0/2) == 1 (exact by construction), rows are unit-norm
    assert jnp.allclose(jnp.diag(outer_product), 1.0, atol=1e-5)
    assert jnp.allclose(jnp.sum(out_feat * out_feat, axis=-1), 1.0, atol=1e-4)
    # symmetry of the RBF kernel
    assert jnp.allclose(outer_product, outer_product.T, atol=1e-5)

    # cross-check the RBF stage against a plain-JAX exact-difference cdist
    # applied to the features returned by the kernel (isolates the distance
    # math from bf16 MLP drift; the in-kernel gram is f32 so this stays tight).
    diff = out_feat[:, None, :] - out_feat[None, :, :]
    d_ref = jnp.sqrt(jnp.sum(diff * diff, axis=-1))
    outer_ref = jnp.exp(-d_ref / 2.0 * (1.0 ** 2))
    assert jnp.allclose(outer_product, outer_ref, atol=2e-4)

    print("KERNEL_OK")
</pallas_src>

<mosaic_0001>
module attributes {stable_mosaic.version = 11 : i64} {
  func.func @_fused_pointdist_kernel(%arg0: i32, %arg1: memref<128x32xf32, #tpu.memory_space<vmem>>, %arg2: memref<32x256xbf16, #tpu.memory_space<vmem>>, %arg3: memref<1x256xf32, #tpu.memory_space<vmem>>, %arg4: memref<256x256xbf16, #tpu.memory_space<vmem>>, %arg5: memref<1x256xf32, #tpu.memory_space<vmem>>, %arg6: memref<256x128xbf16, #tpu.memory_space<vmem>>, %arg7: memref<1x128xf32, #tpu.memory_space<vmem>>, %arg8: memref<128x128xbf16, #tpu.memory_space<vmem>>, %arg9: memref<1x128xf32, #tpu.memory_space<vmem>>, %arg10: memref<128x128xbf16, #tpu.memory_space<vmem>>, %arg11: memref<1x128xf32, #tpu.memory_space<vmem>>, %arg12: memref<128x128xf32, #tpu.memory_space<vmem>>, %arg13: memref<128x128xf32, #tpu.memory_space<vmem>>) attributes {dimension_semantics = [#tpu.dimension_semantics<arbitrary>], iteration_bounds = array<i64: 1>, scalar_prefetch = 0 : i64, scratch_operands = 0 : i64, tpu.core_type = #tpu.core_type<tc>, window_params = [{pipeline_mode = #tpu.pipeline_mode<synchronous>, transform_indices = @transform_0, window_bounds = array<i64: 128, 32>}, {pipeline_mode = #tpu.pipeline_mode<synchronous>, transform_indices = @transform_1, window_bounds = array<i64: 32, 256>}, {pipeline_mode = #tpu.pipeline_mode<synchronous>, transform_indices = @transform_2, window_bounds = array<i64: 1, 256>}, {pipeline_mode = #tpu.pipeline_mode<synchronous>, transform_indices = @transform_3, window_bounds = array<i64: 256, 256>}, {pipeline_mode = #tpu.pipeline_mode<synchronous>, transform_indices = @transform_4, window_bounds = array<i64: 1, 256>}, {pipeline_mode = #tpu.pipeline_mode<synchronous>, transform_indices = @transform_5, window_bounds = array<i64: 256, 128>}, {pipeline_mode = #tpu.pipeline_mode<synchronous>, transform_indices = @transform_6, window_bounds = array<i64: 1, 128>}, {pipeline_mode = #tpu.pipeline_mode<synchronous>, transform_indices = @transform_7, window_bounds = array<i64: 128, 128>}, {pipeline_mode = #tpu.pipeline_mode<synchronous>, transform_indices = @transform_8, window_bounds = array<i64: 1, 128>}, {pipeline_mode = #tpu.pipeline_mode<synchronous>, transform_indices = @transform_9, window_bounds = array<i64: 128, 128>}, {pipeline_mode = #tpu.pipeline_mode<synchronous>, transform_indices = @transform_10, window_bounds = array<i64: 1, 128>}, {pipeline_mode = #tpu.pipeline_mode<synchronous>, transform_indices = @transform_11, window_bounds = array<i64: 128, 128>}, {pipeline_mode = #tpu.pipeline_mode<synchronous>, transform_indices = @transform_12, window_bounds = array<i64: 128, 128>}]} {
    %c0 = arith.constant 0 : index
    %c0_0 = arith.constant 0 : index
    %0 = vector.load %arg1[%c0, %c0_0] : memref<128x32xf32, #tpu.memory_space<vmem>>, vector<128x32xf32>
    %c0_1 = arith.constant 0 : index
    %c0_2 = arith.constant 0 : index
    %1 = vector.load %arg2[%c0_1, %c0_2] : memref<32x256xbf16, #tpu.memory_space<vmem>>, vector<32x256xbf16>
    %c0_3 = arith.constant 0 : index
    %c0_4 = arith.constant 0 : index
    %2 = vector.load %arg3[%c0_3, %c0_4] : memref<1x256xf32, #tpu.memory_space<vmem>>, vector<1x256xf32>
    %3 = arith.truncf %0 : vector<128x32xf32> to vector<128x32xbf16>
    %cst = arith.constant dense<0.000000e+00> : vector<128x256xf32>
    %4 = tpu.matmul %3, %1, %cst {dimension_numbers = #tpu.dot_dimension_numbers<[1], [0], [0], [1], [0, 0, 1, 1], [], []>} : vector<128x32xbf16>, vector<32x256xbf16>, vector<128x256xf32> -> vector<128x256xf32>
    %5 = vector.broadcast %2 : vector<1x256xf32> to vector<128x256xf32>
    %6 = arith.addf %4, %5 : vector<128x256xf32>
    %cst_5 = arith.constant 0.000000e+00 : f32
    %7 = vector.broadcast %cst_5 : f32 to vector<128x256xf32>
    %8 = arith.maximumf %6, %7 : vector<128x256xf32>
    %c0_6 = arith.constant 0 : index
    %c0_7 = arith.constant 0 : index
    %9 = vector.load %arg4[%c0_6, %c0_7] : memref<256x256xbf16, #tpu.memory_space<vmem>>, vector<256x256xbf16>
    %c0_8 = arith.constant 0 : index
    %c0_9 = arith.constant 0 : index
    %10 = vector.load %arg5[%c0_8, %c0_9] : memref<1x256xf32, #tpu.memory_space<vmem>>, vector<1x256xf32>
    %11 = arith.truncf %8 : vector<128x256xf32> to vector<128x256xbf16>
    %cst_10 = arith.constant dense<0.000000e+00> : vector<128x256xf32>
    %12 = tpu.matmul %11, %9, %cst_10 {dimension_numbers = #tpu.dot_dimension_numbers<[1], [0], [0], [1], [0, 0, 1, 1], [], []>} : vector<128x256xbf16>, vector<256x256xbf16>, vector<128x256xf32> -> vector<128x256xf32>
    %13 = vector.broadcast %10 : vector<1x256xf32> to vector<128x256xf32>
    %14 = arith.addf %12, %13 : vector<128x256xf32>
    %cst_11 = arith.constant 0.000000e+00 : f32
    %15 = vector.broadcast %cst_11 : f32 to vector<128x256xf32>
    %16 = arith.maximumf %14, %15 : vector<128x256xf32>
    %c0_12 = arith.constant 0 : index
    %c0_13 = arith.constant 0 : index
    %17 = vector.load %arg6[%c0_12, %c0_13] : memref<256x128xbf16, #tpu.memory_space<vmem>>, vector<256x128xbf16>
    %c0_14 = arith.constant 0 : index
    %c0_15 = arith.constant 0 : index
    %18 = vector.load %arg7[%c0_14, %c0_15] : memref<1x128xf32, #tpu.memory_space<vmem>>, vector<1x128xf32>
    %19 = arith.truncf %16 : vector<128x256xf32> to vector<128x256xbf16>
    %cst_16 = arith.constant dense<0.000000e+00> : vector<128x128xf32>
    %20 = tpu.matmul %19, %17, %cst_16 {dimension_numbers = #tpu.dot_dimension_numbers<[1], [0], [0], [1], [0, 0, 1, 1], [], []>} : vector<128x256xbf16>, vector<256x128xbf16>, vector<128x128xf32> -> vector<128x128xf32>
    %21 = vector.broadcast %18 : vector<1x128xf32> to vector<128x128xf32>
    %22 = arith.addf %20, %21 : vector<128x128xf32>
    %cst_17 = arith.constant 0.000000e+00 : f32
    %23 = vector.broadcast %cst_17 : f32 to vector<128x128xf32>
    %24 = arith.maximumf %22, %23 : vector<128x128xf32>
    %c0_18 = arith.constant 0 : index
    %c0_19 = arith.constant 0 : index
    %25 = vector.load %arg8[%c0_18, %c0_19] : memref<128x128xbf16, #tpu.memory_space<vmem>>, vector<128x128xbf16>
    %c0_20 = arith.constant 0 : index
    %c0_21 = arith.constant 0 : index
    %26 = vector.load %arg9[%c0_20, %c0_21] : memref<1x128xf32, #tpu.memory_space<vmem>>, vector<1x128xf32>
    %27 = arith.truncf %24 : vector<128x128xf32> to vector<128x128xbf16>
    %cst_22 = arith.constant dense<0.000000e+00> : vector<128x128xf32>
    %28 = tpu.matmul %27, %25, %cst_22 {dimension_numbers = #tpu.dot_dimension_numbers<[1], [0], [0], [1], [0, 0, 1, 1], [], []>} : vector<128x128xbf16>, vector<128x128xbf16>, vector<128x128xf32> -> vector<128x128xf32>
    %29 = vector.broadcast %26 : vector<1x128xf32> to vector<128x128xf32>
    %30 = arith.addf %28, %29 : vector<128x128xf32>
    %cst_23 = arith.constant 0.000000e+00 : f32
    %31 = vector.broadcast %cst_23 : f32 to vector<128x128xf32>
    %32 = arith.maximumf %30, %31 : vector<128x128xf32>
    %c0_24 = arith.constant 0 : index
    %c0_25 = arith.constant 0 : index
    %33 = vector.load %arg10[%c0_24, %c0_25] : memref<128x128xbf16, #tpu.memory_space<vmem>>, vector<128x128xbf16>
    %c0_26 = arith.constant 0 : index
    %c0_27 = arith.constant 0 : index
    %34 = vector.load %arg11[%c0_26, %c0_27] : memref<1x128xf32, #tpu.memory_space<vmem>>, vector<1x128xf32>
    %35 = arith.truncf %32 : vector<128x128xf32> to vector<128x128xbf16>
    %cst_28 = arith.constant dense<0.000000e+00> : vector<128x128xf32>
    %36 = tpu.matmul %35, %33, %cst_28 {dimension_numbers = #tpu.dot_dimension_numbers<[1], [0], [0], [1], [0, 0, 1, 1], [], []>} : vector<128x128xbf16>, vector<128x128xbf16>, vector<128x128xf32> -> vector<128x128xf32>
    %37 = vector.broadcast %34 : vector<1x128xf32> to vector<128x128xf32>
    %38 = arith.addf %36, %37 : vector<128x128xf32>
    %39 = arith.mulf %38, %38 : vector<128x128xf32>
    %cst_29 = arith.constant dense<0.000000e+00> : vector<128xf32>
    %40 = vector.multi_reduction <add>, %39, %cst_29 [1] : vector<128x128xf32> to vector<128xf32>
    %41 = vector.shape_cast %40 : vector<128xf32> to vector<128x1xf32>
    %cst_30 = arith.constant 1.000000e-24 : f32
    %42 = vector.broadcast %cst_30 : f32 to vector<128x1xf32>
    %43 = arith.maximumf %41, %42 : vector<128x1xf32>
    %44 = math.rsqrt %43 : vector<128x1xf32>
    %45 = vector.broadcast %44 : vector<128x1xf32> to vector<128x128xf32>
    %46 = arith.mulf %38, %45 : vector<128x128xf32>
    %cst_31 = arith.constant dense<0.000000e+00> : vector<128x128xf32>
    %47 = tpu.matmul %46, %46, %cst_31 {dimension_numbers = #tpu.dot_dimension_numbers<[1], [1], [0], [0], [0, 0, 1, 0], [], []>} : vector<128x128xf32>, vector<128x128xf32>, vector<128x128xf32> -> vector<128x128xf32>
    %48 = tpu.iota {dimensions = array<i32: 0>} : vector<128x128xi32>
    %49 = tpu.iota {dimensions = array<i32: 1>} : vector<128x128xi32>
    %50 = arith.cmpi eq, %48, %49 : vector<128x128xi32>
    %cst_32 = arith.constant 0.000000e+00 : f32
    %51 = vector.broadcast %cst_32 : f32 to vector<128x128xf32>
    %52 = arith.select %50, %47, %51 : vector<128x128xi1>, vector<128x128xf32>
    %cst_33 = arith.constant dense<0.000000e+00> : vector<128xf32>
    %53 = vector.multi_reduction <add>, %52, %cst_33 [0] : vector<128x128xf32> to vector<128xf32>
    %54 = vector.shape_cast %53 : vector<128xf32> to vector<1x128xf32>
    %55 = tpu.transpose %54, [1, 0] : vector<1x128xf32> -> vector<128x1xf32>
    %56 = vector.broadcast %55 : vector<128x1xf32> to vector<128x128xf32>
    %57 = vector.broadcast %54 : vector<1x128xf32> to vector<128x128xf32>
    %58 = arith.addf %56, %57 : vector<128x128xf32>
    %cst_34 = arith.constant 2.000000e+00 : f32
    %59 = vector.broadcast %cst_34 : f32 to vector<128x128xf32>
    %60 = arith.mulf %59, %47 : vector<128x128xf32>
    %61 = arith.subf %58, %60 : vector<128x128xf32>
    %cst_35 = arith.constant 0.000000e+00 : f32
    %62 = vector.broadcast %cst_35 : f32 to vector<128x128xf32>
    %63 = arith.maximumf %61, %62 : vector<128x128xf32>
    %64 = math.sqrt %63 : vector<128x128xf32>
    %cst_36 = arith.constant 0.000000e+00 : f32
    %65 = vector.broadcast %cst_36 : f32 to vector<128x128xf32>
    %66 = arith.subf %65, %64 : vector<128x128xf32>
    %cst_37 = arith.constant 2.000000e+00 : f32
    %67 = vector.broadcast %cst_37 : f32 to vector<128x128xf32>
    %68 = arith.divf %66, %67 : vector<128x128xf32>
    %cst_38 = arith.constant 1.000000e+00 : f32
    %69 = vector.broadcast %cst_38 : f32 to vector<128x128xf32>
    %70 = arith.mulf %68, %69 : vector<128x128xf32>
    %71 = math.exp %70 : vector<128x128xf32>
    %c0_39 = arith.constant 0 : index
    %c0_40 = arith.constant 0 : index
    %72 = vector.load %arg12[%c0_39, %c0_40] : memref<128x128xf32, #tpu.memory_space<vmem>>, vector<128x128xf32>
    tpu.vector_store %arg12[%c0_39, %c0_40], %71 {strides = array<i32>} : memref<128x128xf32, #tpu.memory_space<vmem>>, vector<128x128xf32>,
    %c0_41 = arith.constant 0 : index
    %c0_42 = arith.constant 0 : index
    %73 = vector.load %arg13[%c0_41, %c0_42] : memref<128x128xf32, #tpu.memory_space<vmem>>, vector<128x128xf32>
    tpu.vector_store %arg13[%c0_41, %c0_42], %46 {strides = array<i32>} : memref<128x128xf32, #tpu.memory_space<vmem>>, vector<128x128xf32>,
    return
  }
  func.func @transform_0(%arg0: i32) -> (i32, i32) {
    %c0_i32 = arith.constant 0 : i32
    %c0_i32_0 = arith.constant 0 : i32
    %c0_i32_1 = arith.constant 0 : i32
    return %c0_i32, %c0_i32_0 : i32, i32
  }
  func.func @transform_1(%arg0: i32) -> (i32, i32) {
    %c0_i32 = arith.constant 0 : i32
    %c0_i32_0 = arith.constant 0 : i32
    %c0_i32_1 = arith.constant 0 : i32
    return %c0_i32, %c0_i32_0 : i32, i32
  }
  func.func @transform_2(%arg0: i32) -> (i32, i32) {
    %c0_i32 = arith.constant 0 : i32
    %c0_i32_0 = arith.constant 0 : i32
    %c0_i32_1 = arith.constant 0 : i32
    return %c0_i32, %c0_i32_0 : i32, i32
  }
  func.func @transform_3(%arg0: i32) -> (i32, i32) {
    %c0_i32 = arith.constant 0 : i32
    %c0_i32_0 = arith.constant 0 : i32
    %c0_i32_1 = arith.constant 0 : i32
    return %c0_i32, %c0_i32_0 : i32, i32
  }
  func.func @transform_4(%arg0: i32) -> (i32, i32) {
    %c0_i32 = arith.constant 0 : i32
    %c0_i32_0 = arith.constant 0 : i32
    %c0_i32_1 = arith.constant 0 : i32
    return %c0_i32, %c0_i32_0 : i32, i32
  }
  func.func @transform_5(%arg0: i32) -> (i32, i32) {
    %c0_i32 = arith.constant 0 : i32
    %c0_i32_0 = arith.constant 0 : i32
    %c0_i32_1 = arith.constant 0 : i32
    return %c0_i32, %c0_i32_0 : i32, i32
  }
  func.func @transform_6(%arg0: i32) -> (i32, i32) {
    %c0_i32 = arith.constant 0 : i32
    %c0_i32_0 = arith.constant 0 : i32
    %c0_i32_1 = arith.constant 0 : i32
    return %c0_i32, %c0_i32_0 : i32, i32
  }
  func.func @transform_7(%arg0: i32) -> (i32, i32) {
    %c0_i32 = arith.constant 0 : i32
    %c0_i32_0 = arith.constant 0 : i32
    %c0_i32_1 = arith.constant 0 : i32
    return %c0_i32, %c0_i32_0 : i32, i32
  }
  func.func @transform_8(%arg0: i32) -> (i32, i32) {
    %c0_i32 = arith.constant 0 : i32
    %c0_i32_0 = arith.constant 0 : i32
    %c0_i32_1 = arith.constant 0 : i32
    return %c0_i32, %c0_i32_0 : i32, i32
  }
  func.func @transform_9(%arg0: i32) -> (i32, i32) {
    %c0_i32 = arith.constant 0 : i32
    %c0_i32_0 = arith.constant 0 : i32
    %c0_i32_1 = arith.constant 0 : i32
    return %c0_i32, %c0_i32_0 : i32, i32
  }
  func.func @transform_10(%arg0: i32) -> (i32, i32) {
    %c0_i32 = arith.constant 0 : i32
    %c0_i32_0 = arith.constant 0 : i32
    %c0_i32_1 = arith.constant 0 : i32
    return %c0_i32, %c0_i32_0 : i32, i32
  }
  func.func @transform_11(%arg0: i32) -> (i32, i32) {
    %c0_i32 = arith.constant 0 : i32
    %c0_i32_0 = arith.constant 0 : i32
    %c0_i32_1 = arith.constant 0 : i32
    return %c0_i32, %c0_i32_0 : i32, i32
  }
  func.func @transform_12(%arg0: i32) -> (i32, i32) {
    %c0_i32 = arith.constant 0 : i32
    %c0_i32_0 = arith.constant 0 : i32
    %c0_i32_1 = arith.constant 0 : i32
    return %c0_i32, %c0_i32_0 : i32, i32
  }
}

</mosaic_0001>

<bundles_post_ra>
// kernel: point_distance_kernel_forward.1
= control target key start
LH: loop header
LB: loop body
LE: loop exit
PB: predicated region body
PF: predicated region fallthrough
CT: control target
= control target key end

     0   :  { %18 = vsyncpa [#allocation3], 0  ;;  %s3484_s0 = inlined_call_operand.vmem [shape: f32[128,32], index: 0, kind: input, shape index: {}]   ;;  %s3485_s1 = inlined_call_operand.hbm [shape: bf16[32,256], index: 1, kind: input, shape index: {}]   ;;  %s3486_s2 = inlined_call_operand.vmem [shape: f32[1,256], index: 2, kind: input, shape index: {}]   ;;  %s3487_s3 = inlined_call_operand.vmem [shape: bf16[256,256], index: 3, kind: input, shape index: {}]   ;;  %s3488_s4 = inlined_call_operand.vmem [shape: f32[1,256], index: 4, kind: input, shape index: {}]   ;;  %s3489_s5 = inlined_call_operand.vmem [shape: bf16[256,128], index: 5, kind: input, shape index: {}]   ;;  %s3490_s6 = inlined_call_operand.vmem [shape: f32[1,128], index: 6, kind: input, shape index: {}]   ;;  %s3491_s7 = inlined_call_operand.vmem [shape: bf16[128,128], index: 7, kind: input, shape index: {}]   ;;  %s3492_s8 = inlined_call_operand.vmem [shape: f32[1,128], index: 8, kind: input, shape index: {}]   ;;  %s3493_s9 = inlined_call_operand.hbm [shape: bf16[128,128], index: 9, kind: input, shape index: {}]   ;;  %s3494_s10 = inlined_call_operand.vmem [shape: f32[1,128], index: 10, kind: input, shape index: {}]   ;;  %s3495_s11 = inlined_call_operand.vmem [shape: f32[128,128], index: 11, kind: output, shape index: {0}]   ;;  %s3496_s12 = inlined_call_operand.vmem [shape: f32[128,128], index: 12, kind: output, shape index: {1}]  }
   0x1   :  { %19 = vsyncpa [#allocation5], 0  ;;  %s2635_s21 = smov [#allocation2]   ;;  %s2587_s25 = scalar_lea.hbm %s3485_s1, 512 }
   0x2   :  { %s27_s22 = sshll.u32 %s2635_s21, 4  ;;  %p2588_p0 = scmp.ne.s32.totalorder %s3485_s1, %s2587_s25  ;;  %s28_s22 = int_to_ptr.vmem [resolvable:$true] %s27_s22 }
   0x3   :  { %p2591_p1 = scmp.lt.u32.totalorder %s2587_s25, %s3485_s1 }
   0x5   :  { %p2593_p2 = pnand %p2591_p1, %p2588_p0 }
   0x7   :  { %2596 = shalt.err (!%p2593_p2)
}
   0x8   :  { %s2597_s30 = scalar_lea.vmem %s28_s22, 512  ;;  %p2602_p4 = scmp.lt.s32.totalorder %s28_s22, %s28_s22 }
   0x9   :  { %p2598_p3 = scmp.ne.s32.totalorder %s28_s22, %s2597_s30  ;;  %p2603_p5 = scmp.lt.s32.totalorder %s2597_s30, %s2597_s30 }
   0xb   :  { %p2604_p6 = por %p2603_p5, %p2602_p4 }
   0xd   :  { %p2605_p7 = pnand %p2604_p6, %p2598_p3 }
   0xf   :  { %2608 = shalt.err (!%p2605_p7)
}
  0x10   :  { %s2636_s13 = smov 128   ;;  %s2637_s14 = smov 8  }
  0x11   :  { %33 = dma.hbm_to_vmem [thread:$0]  %s3485_s1, 512, %s28_s22, [#allocation3], %s2636_s13, %s2636_s13, %s2637_s14  }
  0x12   :  { %s2638_s17 = smov [#allocation4]   ;;  %s2609_s21 = scalar_lea.hbm %s3493_s9, 1024 }
  0x13   :  { %s53_s18 = sshll.u32 %s2638_s17, 4  ;;  %p2610_p8 = scmp.ne.s32.totalorder %s3493_s9, %s2609_s21  ;;  %s54_s18 = int_to_ptr.vmem [resolvable:$true] %s53_s18 }
  0x14   :  { %p2613_p9 = scmp.lt.u32.totalorder %s2609_s21, %s3493_s9 }
  0x16   :  { %p2615_p10 = pnand %p2613_p9, %p2610_p8 }
  0x18   :  { %2618 = shalt.err (!%p2615_p10)
}
  0x19   :  { %s2619_s27 = scalar_lea.vmem %s54_s18, 1024  ;;  %p2624_p12 = scmp.lt.s32.totalorder %s54_s18, %s54_s18 }
  0x1a   :  { %p2620_p11 = scmp.ne.s32.totalorder %s54_s18, %s2619_s27  ;;  %p2625_p13 = scmp.lt.s32.totalorder %s2619_s27, %s2619_s27 }
  0x1c   :  { %p2626_p0 = por %p2625_p13, %p2624_p12 }
  0x1e   :  { %p2627_p1 = pnand %p2626_p0, %p2620_p11 }
  0x20   :  { %2630 = shalt.err (!%p2627_p1)
}
  0x21   :  { %s2639_s1 = smov 64   ;;  %s2640_s22 = smov 4  }
  0x22   :  { %59 = dma.hbm_to_vmem [thread:$0]  %s3493_s9, 1024, %s54_s18, [#allocation5], %s2639_s1, %s2639_s1, %s2640_s22  }
  0x23   :  { %2631 = dma.done.wait [#allocation3], 512  }
  0x24   :  { %2632 = vsyncadd [#allocation3], 4294966784 }
  0x25   :  { %2633 = dma.done.wait [#allocation5], 1024  }
  0x26   :  { %2634 = vsyncadd [#allocation5], 4294966272  ;;  %v2641_v0 = vmov 0   ;;  %v2405_v1 = vld [vmem:[#allocation2 + $0x4] ss:$8 sps:$4 sm:$0xff]   ;;  %vm129_vm0 = vcmask 261120   ;;  %v99_v62 = vlaneseq }
  0x27   :  { %186 = vmatprep.mubr.bf16.mxu0 %v2641_v0  ;;  %2403 = vset.pattern.permute.xlu1 %v2641_v0  ;;  %v2407_v2 = vld [vmem:[#allocation2] ss:$8 sps:$4 sm:$0xff]   ;;  %v2408_v3 = vld [vmem:[#allocation2 + $0x14] ss:$8 sps:$4 sm:$0xff]   ;;  %v2410_v4 = vld [vmem:[#allocation2 + $0x10] ss:$8 sps:$4 sm:$0xff]  }
  0x28   :  { %154 = vmatprep.subr.bf16.mxu0 %v2405_v1  ;;  %v69_v5 = vld [vmem:[%s3484_s0] sm:$0xff]  ;;  %v70_v6 = vld [vmem:[%s3484_s0 + $0x8] sm:$0xff]  ;;  %v2416_v10 = vld [vmem:[%s3487_s3 + $0x14] ss:$8 sps:$4 sm:$0xff]   ;;  %v2896_v63 = vshrl.u32 %v99_v62, 7 }
  0x29   :  { %155 = vmatpush1.bf16.msra.mxu0 %v2407_v2  ;;  %v90_v7 = vpack.c.bf16 %v70_v6, %v69_v5  ;;  %v2411_v8 = vld [vmem:[%s3487_s3] ss:$8 sps:$4 sm:$0xff]   ;;  %v2413_v9 = vld [vmem:[%s3487_s3 + $0x4] ss:$8 sps:$4 sm:$0xff]   ;;  %v71_v11 = vld [vmem:[%s3484_s0 + $0x10] sm:$0xff] }
  0x2a   :  { %156 = vmatprep.subr.bf16.mxu0 %v2408_v3  ;;  %v72_v12 = vld [vmem:[%s3484_s0 + $0x18] sm:$0xff]  ;;  %2363 = vmatprep.subr.bf16.mxu1 %v2413_v9  ;;  %v2419_v14 = vld [vmem:[%s3487_s3 + $0x24] ss:$8 sps:$4 sm:$0xff]   ;;  %v2417_v16 = vld [vmem:[%s3487_s3 + $0x20] ss:$8 sps:$4 sm:$0xff]   ;;  %v101_v1 = vsub.s32 0, %v2896_v63 }
  0x2b   :  { %v2414_v13 = vld [vmem:[%s3487_s3 + $0x10] ss:$8 sps:$4 sm:$0xff]   ;;  %2379 = vmatpush1.bf16.msra.mxu1 %v2411_v8  ;;  %v91_v15 = vpack.c.bf16 %v72_v12, %v71_v11  ;;  %v2422_v17 = vld [vmem:[%s3487_s3 + $0x34] ss:$8 sps:$4 sm:$0xff]   ;;  %v73_v18 = vld [vmem:[%s3484_s0 + $0x20] sm:$0xff]  ;;  %v105_v3 = vsub.s32 1, %v2896_v63 }
  0x2c   :  { %2364 = vmatprep.subr.bf16.mxu1 %v2416_v10  ;;  %v74_v19 = vld [vmem:[%s3484_s0 + $0x28] sm:$0xff]  ;;  %v2420_v20 = vld [vmem:[%s3487_s3 + $0x30] ss:$8 sps:$4 sm:$0xff]   ;;  %v2428_v24 = vld [vmem:[%s3487_s3 + $0x54] ss:$8 sps:$4 sm:$0xff]  }
  0x2d   :  { %157 = vmatpush1.bf16.msra.mxu0 %v2410_v4  ;;  %v2425_v21 = vld [vmem:[%s3487_s3 + $0x44] ss:$8 sps:$4 sm:$0xff]   ;;  %v92_v22 = vpack.c.bf16 %v74_v19, %v73_v18  ;;  %v2423_v23 = vld [vmem:[%s3487_s3 + $0x40] ss:$8 sps:$4 sm:$0xff]   ;;  %v75_v25 = vld [vmem:[%s3484_s0 + $0x30] sm:$0xff] }
  0x2e   :  { %519 = vmatprep.subr.bf16.mxu0 %v2413_v9  ;;  %v76_v26 = vld [vmem:[%s3484_s0 + $0x38] sm:$0xff]  ;;  %v2431_v28 = vld [vmem:[%s3487_s3 + $0x64] ss:$8 sps:$4 sm:$0xff]   ;;  %v2429_v30 = vld [vmem:[%s3487_s3 + $0x60] ss:$8 sps:$4 sm:$0xff]  }
  0x2f   :  { %2380 = vmatpush1.bf16.msra.mxu1 %v2414_v13  ;;  %v2426_v27 = vld [vmem:[%s3487_s3 + $0x50] ss:$8 sps:$4 sm:$0xff]   ;;  %v93_v29 = vpack.c.bf16 %v76_v26, %v75_v25  ;;  %v2434_v31 = vld [vmem:[%s3487_s3 + $0x74] ss:$8 sps:$4 sm:$0xff]   ;;  %v77_v32 = vld [vmem:[%s3484_s0 + $0x40] sm:$0xff] }
  0x30   :  { %2008 = vmatmul.mubr.msk.bf16.vlgmr.msra.gmra.mrb[0].mxu0 %vm129_vm0, %v90_v7  ;;  %2365 = vmatprep.subr.bf16.mxu1 %v2419_v14  ;;  %v78_v33 = vld [vmem:[%s3484_s0 + $0x48] sm:$0xff]  ;;  %v2432_v34 = vld [vmem:[%s3487_s3 + $0x70] ss:$8 sps:$4 sm:$0xff]   ;;  %v2440_v38 = vld [vmem:[%s3487_s3 + $0x94] ss:$8 sps:$4 sm:$0xff]  }
  0x31   :  { %196 = vmatprep.mubr.bf16.mxu0 %v2641_v0  ;;  %520 = vmatpush1.bf16.msra.mxu0 %v2411_v8  ;;  %v2437_v35 = vld [vmem:[%s3487_s3 + $0x84] ss:$8 sps:$4 sm:$0xff]   ;;  %v94_v36 = vpack.c.bf16 %v78_v33, %v77_v32  ;;  %v2435_v37 = vld [vmem:[%s3487_s3 + $0x80] ss:$8 sps:$4 sm:$0xff]   ;;  %v79_v39 = vld [vmem:[%s3484_s0 + $0x50] sm:$0xff] }
  0x32   :  { %521 = vmatprep.subr.bf16.mxu0 %v2416_v10  ;;  %v80_v40 = vld [vmem:[%s3484_s0 + $0x58] sm:$0xff]  ;;  %v2443_v42 = vld [vmem:[%s3487_s3 + $0xa4] ss:$8 sps:$4 sm:$0xff]   ;;  %v2441_v44 = vld [vmem:[%s3487_s3 + $0xa0] ss:$8 sps:$4 sm:$0xff]  }
  0x33   :  { %2381 = vmatpush1.bf16.msra.mxu1 %v2417_v16  ;;  %v2438_v41 = vld [vmem:[%s3487_s3 + $0x90] ss:$8 sps:$4 sm:$0xff]   ;;  %v95_v43 = vpack.c.bf16 %v80_v40, %v79_v39  ;;  %v2446_v45 = vld [vmem:[%s3487_s3 + $0xb4] ss:$8 sps:$4 sm:$0xff]   ;;  %v81_v46 = vld [vmem:[%s3484_s0 + $0x60] sm:$0xff] }
  0x34   :  { %2366 = vmatprep.subr.bf16.mxu1 %v2422_v17  ;;  %v82_v47 = vld [vmem:[%s3484_s0 + $0x68] sm:$0xff]  ;;  %v2444_v48 = vld [vmem:[%s3487_s3 + $0xb0] ss:$8 sps:$4 sm:$0xff]   ;;  %v2452_v52 = vld [vmem:[%s3487_s3 + $0xd4] ss:$8 sps:$4 sm:$0xff]  }
  0x35   :  { %522 = vmatpush1.bf16.msra.mxu0 %v2414_v13  ;;  %v2449_v49 = vld [vmem:[%s3487_s3 + $0xc4] ss:$8 sps:$4 sm:$0xff]   ;;  %v96_v50 = vpack.c.bf16 %v82_v47, %v81_v46  ;;  %v2447_v51 = vld [vmem:[%s3487_s3 + $0xc0] ss:$8 sps:$4 sm:$0xff]   ;;  %v83_v53 = vld [vmem:[%s3484_s0 + $0x70] sm:$0xff] }
  0x36   :  { %523 = vmatprep.subr.bf16.mxu0 %v2419_v14  ;;  %v84_v54 = vld [vmem:[%s3484_s0 + $0x78] sm:$0xff]  ;;  %v2455_v57 = vld [vmem:[%s3487_s3 + $0xe4] ss:$8 sps:$4 sm:$0xff]   ;;  %v2453_v58 = vld [vmem:[%s3487_s3 + $0xe0] ss:$8 sps:$4 sm:$0xff]  }
  0x37   :  { %2382 = vmatpush1.bf16.msra.mxu1 %v2420_v20  ;;  %v2450_v55 = vld [vmem:[%s3487_s3 + $0xd0] ss:$8 sps:$4 sm:$0xff]   ;;  %v97_v56 = vpack.c.bf16 %v84_v54, %v83_v53  ;;  %v2458_v59 = vld [vmem:[%s3487_s3 + $0xf4] ss:$8 sps:$4 sm:$0xff]   ;;  %v2459_v61 = vld [vmem:[%s3489_s5 + $0x40] sm:$0xff]  }
  0x38   :  { %2009 = vmatmul.mubr.msk.bf16.gmra.mrb[4].mxu0 %vm129_vm0, %v91_v15  ;;  %2367 = vmatprep.subr.bf16.mxu1 %v2425_v21  ;;  %v2456_v60 = vld [vmem:[%s3487_s3 + $0xf0] ss:$8 sps:$4 sm:$0xff]   ;;  %v89_v2 = vld [vmem:[%s3486_s2] sm:$0x3] }
  0x39   :  { %206 = vmatprep.mubr.bf16.mxu0 %v2641_v0  ;;  %524 = vmatpush1.bf16.msra.mxu0 %v2417_v16  ;;  %v2905_v4 = vrot.slane %v89_v2, %v101_v1  ;;  %v2909_v5 = vrot.slane %v89_v2, %v105_v3  ;;  %v2463_v33 = vld [vmem:[%s3489_s5 + $0x50] sm:$0xff]  }
  0x3a   :  { %525 = vmatprep.subr.bf16.mxu0 %v2422_v17  ;;  %v2464_v39 = vld [vmem:[%s3489_s5 + $0x10] sm:$0xff]  }
  0x3b   :  { %2383 = vmatpush1.bf16.msra.mxu1 %v2423_v23 }
  0x3c   :  { %2368 = vmatprep.subr.bf16.mxu1 %v2428_v24 }
  0x3d   :  { %526 = vmatpush1.bf16.msra.mxu0 %v2420_v20 }
  0x3e   :  { %527 = vmatprep.subr.bf16.mxu0 %v2425_v21  ;;  %v2460_v21 = vld [vmem:[%s3489_s5] sm:$0xff]  }
  0x3f   :  { %2384 = vmatpush1.bf16.msra.mxu1 %v2426_v27 }
  0x40   :  { %2010 = vmatmul.mubr.msk.bf16.gmra.mrb[8].mxu0 %vm129_vm0, %v92_v22  ;;  %2369 = vmatprep.subr.bf16.mxu1 %v2431_v28 }
  0x41   :  { %216 = vmatprep.mubr.bf16.mxu0 %v2641_v0  ;;  %528 = vmatpush1.bf16.msra.mxu0 %v2423_v23 }
  0x42   :  { %529 = vmatprep.subr.bf16.mxu0 %v2428_v24  ;;  %v2461_v24 = vld [vmem:[%s3489_s5 + $0x48] sm:$0xff]  }
  0x43   :  { %2385 = vmatpush1.bf16.msra.mxu1 %v2429_v30 }
  0x44   :  { %2370 = vmatprep.subr.bf16.mxu1 %v2434_v31 }
  0x45   :  { %530 = vmatpush1.bf16.msra.mxu0 %v2426_v27 }
  0x46   :  { %531 = vmatprep.subr.bf16.mxu0 %v2431_v28 }
  0x47   :  { %2386 = vmatpush1.bf16.msra.mxu1 %v2432_v34 }
  0x48   :  { %2011 = vmatmul.mubr.msk.bf16.gmra.mrb[12].mxu0 %vm129_vm0, %v93_v29  ;;  %2371 = vmatprep.subr.bf16.mxu1 %v2437_v35 }
  0x49   :  { %226 = vmatprep.mubr.bf16.mxu0 %v2641_v0  ;;  %532 = vmatpush1.bf16.msra.mxu0 %v2429_v30  ;;  %v2462_v30 = vld [vmem:[%s3489_s5 + $0x8] sm:$0xff]  }
  0x4a   :  { %533 = vmatprep.subr.bf16.mxu0 %v2434_v31 }
  0x4b   :  { %2387 = vmatpush1.bf16.msra.mxu1 %v2435_v37 }
  0x4c   :  { %2372 = vmatprep.subr.bf16.mxu1 %v2440_v38 }
  0x4d   :  { %534 = vmatpush1.bf16.msra.mxu0 %v2432_v34 }
  0x4e   :  { %535 = vmatprep.subr.bf16.mxu0 %v2437_v35 }
  0x4f   :  { %2388 = vmatpush1.bf16.msra.mxu1 %v2438_v41 }
  0x50   :  { %2012 = vmatmul.mubr.msk.bf16.gmra.mrb[16].mxu0 %vm129_vm0, %v94_v36  ;;  %2373 = vmatprep.subr.bf16.mxu1 %v2443_v42 }
  0x51   :  { %236 = vmatprep.mubr.bf16.mxu0 %v2641_v0  ;;  %536 = vmatpush1.bf16.msra.mxu0 %v2435_v37 }
  0x52   :  { %537 = vmatprep.subr.bf16.mxu0 %v2440_v38 }
  0x53   :  { %2389 = vmatpush1.bf16.msra.mxu1 %v2441_v44 }
  0x54   :  { %2374 = vmatprep.subr.bf16.mxu1 %v2446_v45 }
  0x55   :  { %538 = vmatpush1.bf16.msra.mxu0 %v2438_v41 }
  0x56   :  { %539 = vmatprep.subr.bf16.mxu0 %v2443_v42  ;;  %v2465_v42 = vld [vmem:[%s3489_s5 + $0x58] sm:$0xff]  }
  0x57   :  { %2390 = vmatpush1.bf16.msra.mxu1 %v2444_v48 }
  0x58   :  { %2013 = vmatmul.mubr.msk.bf16.gmra.mrb[20].mxu0 %vm129_vm0, %v95_v43  ;;  %2375 = vmatprep.subr.bf16.mxu1 %v2449_v49 }
  0x59   :  { %246 = vmatprep.mubr.bf16.mxu0 %v2641_v0  ;;  %540 = vmatpush1.bf16.msra.mxu0 %v2441_v44 }
  0x5a   :  { %541 = vmatprep.subr.bf16.mxu0 %v2446_v45 }
  0x5b   :  { %2391 = vmatpush1.bf16.msra.mxu1 %v2447_v51 }
  0x5c   :  { %2376 = vmatprep.subr.bf16.mxu1 %v2452_v52 }
  0x5d   :  { %542 = vmatpush1.bf16.msra.mxu0 %v2444_v48 }
  0x5e   :  { %543 = vmatprep.subr.bf16.mxu0 %v2449_v49 }
  0x5f   :  { %2392 = vmatpush1.bf16.msra.mxu1 %v2450_v55 }
  0x60   :  { %2014 = vmatmul.mubr.msk.bf16.gmra.mrb[24].mxu0 %vm129_vm0, %v96_v50  ;;  %2377 = vmatprep.subr.bf16.mxu1 %v2455_v57  ;;  %v2466_v50 = vld [vmem:[%s3489_s5 + $0x18] sm:$0xff]  }
  0x61   :  { %256 = vmatprep.mubr.bf16.mxu0 %v2641_v0  ;;  %544 = vmatpush1.bf16.msra.mxu0 %v2447_v51 }
  0x62   :  { %545 = vmatprep.subr.bf16.mxu0 %v2452_v52  ;;  %v2467_v52 = vld [vmem:[%s3489_s5 + $0x60] sm:$0xff]  }
  0x63   :  { %2393 = vmatpush1.bf16.msra.mxu1 %v2453_v58 }
  0x64   :  { %2378 = vmatprep.subr.bf16.mxu1 %v2458_v59 }
  0x65   :  { %546 = vmatpush1.bf16.msra.mxu0 %v2450_v55 }
  0x66   :  { %547 = vmatprep.subr.bf16.mxu0 %v2455_v57  ;;  %v2468_v57 = vld [vmem:[%s3489_s5 + $0x20] sm:$0xff]  }
  0x67   :  { %2394 = vmatpush1.bf16.msra.mxu1 %v2456_v60 }
  0x68   :  { %2015 = vmatmul.mubr.msk.bf16.gmra.mrb[28].mxu0 %vm129_vm0, %v97_v56 }
  0x69   :  { %548 = vmatpush1.bf16.msra.mxu0 %v2453_v58 }
  0x6a   :  { %549 = vmatprep.subr.bf16.mxu0 %v2458_v59 }
  0x6d   :  { %550 = vmatpush1.bf16.msra.mxu0 %v2456_v60  ;;  %v2469_v60 = vld [vmem:[%s3489_s5 + $0x68] sm:$0xff]  }
  0x6e   :  { %2083 = vmatprep.subr.bf16.mxu0 %v2459_v61 }
 0x103   :  { %v188_v6 = vpop.f32.mrb[0].mxu0 }
 0x104   :  { %v189_v7 = vadd.f32 %v188_v6, %v2905_v4  ;;  %v190_v8 = vpop.f32.mrb[1].mxu0 }
 0x105   :  { %v191_v9 = vadd.f32 %v190_v8, %v2909_v5  ;;  %v192_v10 = vpop.f32.mrb[2].mxu0 }
 0x106   :  { %v193_v11 = vadd.f32 %v192_v10, %v2905_v4  ;;  %v194_v12 = vpop.f32.mrb[3].mxu0  ;;  %v267_v14 = vmax.f32 %v189_v7, 0.0 }
 0x107   :  { %v195_v13 = vadd.f32 %v194_v12, %v2909_v5  ;;  %v268_v16 = vmax.f32 %v191_v9, 0.0 }
 0x108   :  { %v269_v15 = vmax.f32 %v193_v11, 0.0  ;;  %v2470_v11 = vld [vmem:[%s3489_s5 + $0x28] sm:$0xff]  }
 0x109   :  { %v270_v17 = vmax.f32 %v195_v13, 0.0 }
 0x10a   :  { %v332_v18 = vpack.c.bf16 %v269_v15, %v267_v14 }
 0x10b   :  { %v333_v19 = vpack.c.bf16 %v270_v17, %v268_v16  ;;  %v198_v20 = vpop.f32.mrb[4].mxu0 }
 0x10c   :  { %v199_v22 = vadd.f32 %v198_v20, %v2905_v4  ;;  %v200_v23 = vpop.f32.mrb[5].mxu0 }
 0x10d   :  { %v201_v25 = vadd.f32 %v200_v23, %v2909_v5  ;;  %v202_v26 = vpop.f32.mrb[6].mxu0  ;;  %551 = vmatprep.mubr.bf16.mxu0 %v333_v19 }
 0x10e   :  { %v203_v27 = vadd.f32 %v202_v26, %v2905_v4  ;;  %v204_v28 = vpop.f32.mrb[7].mxu0  ;;  %552 = vmatmul.mubr.bf16.vlgmr.msra.gmra.mrb[32].mxu0 %v332_v18  ;;  %v271_v31 = vmax.f32 %v199_v22, 0.0 }
 0x10f   :  { %v205_v29 = vadd.f32 %v204_v28, %v2909_v5  ;;  %2084 = vmatpush3.bf16.msra.mxu0 %v2460_v21  ;;  %v272_v34 = vmax.f32 %v201_v25, 0.0 }
 0x110   :  { %v273_v32 = vmax.f32 %v203_v27, 0.0  ;;  %2085 = vmatprep.subr.bf16.mxu0 %v2461_v24 }
 0x111   :  { %v274_v35 = vmax.f32 %v205_v29, 0.0 }
 0x112   :  { %v334_v36 = vpack.c.bf16 %v273_v32, %v271_v31 }
 0x113   :  { %v335_v37 = vpack.c.bf16 %v274_v35, %v272_v34  ;;  %v208_v38 = vpop.f32.mrb[8].mxu0  ;;  %2086 = vmatpush3.bf16.msra.mxu0 %v2462_v30 }
 0x114   :  { %v209_v40 = vadd.f32 %v208_v38, %v2905_v4  ;;  %v210_v41 = vpop.f32.mrb[9].mxu0  ;;  %2087 = vmatprep.subr.bf16.mxu0 %v2463_v33 }
 0x115   :  { %v211_v43 = vadd.f32 %v210_v41, %v2909_v5  ;;  %v212_v44 = vpop.f32.mrb[10].mxu0  ;;  %561 = vmatprep.mubr.bf16.mxu0 %v335_v37 }
 0x116   :  { %v275_v45 = vmax.f32 %v209_v40, 0.0  ;;  %v213_v46 = vadd.f32 %v212_v44, %v2905_v4  ;;  %v214_v47 = vpop.f32.mrb[11].mxu0  ;;  %562 = vmatmul.mubr.bf16.gmra.mrb[36].mxu0 %v334_v36 }
 0x117   :  { %v276_v48 = vmax.f32 %v211_v43, 0.0  ;;  %v215_v49 = vadd.f32 %v214_v47, %v2909_v5  ;;  %2088 = vmatpush3.bf16.msra.mxu0 %v2464_v39 }
 0x118   :  { %v277_v51 = vmax.f32 %v213_v46, 0.0  ;;  %2089 = vmatprep.subr.bf16.mxu0 %v2465_v42 }
 0x119   :  { %v278_v53 = vmax.f32 %v215_v49, 0.0 }
 0x11a   :  { %v336_v54 = vpack.c.bf16 %v277_v51, %v275_v45 }
 0x11b   :  { %v337_v55 = vpack.c.bf16 %v278_v53, %v276_v48  ;;  %v218_v56 = vpop.f32.mrb[12].mxu0  ;;  %2090 = vmatpush3.bf16.msra.mxu0 %v2466_v50 }
 0x11c   :  { %v219_v58 = vadd.f32 %v218_v56, %v2905_v4  ;;  %v220_v59 = vpop.f32.mrb[13].mxu0  ;;  %2091 = vmatprep.subr.bf16.mxu0 %v2467_v52 }
 0x11d   :  { %v221_v61 = vadd.f32 %v220_v59, %v2909_v5  ;;  %v222_v2 = vpop.f32.mrb[14].mxu0  ;;  %571 = vmatprep.mubr.bf16.mxu0 %v337_v55 }
 0x11e   :  { %v279_v6 = vmax.f32 %v219_v58, 0.0  ;;  %v223_v7 = vadd.f32 %v222_v2, %v2905_v4  ;;  %v224_v8 = vpop.f32.mrb[15].mxu0  ;;  %572 = vmatmul.mubr.bf16.gmra.mrb[40].mxu0 %v336_v54 }
 0x11f   :  { %v280_v9 = vmax.f32 %v221_v61, 0.0  ;;  %v225_v10 = vadd.f32 %v224_v8, %v2909_v5  ;;  %2092 = vmatpush3.bf16.msra.mxu0 %v2468_v57 }
 0x120   :  { %v281_v12 = vmax.f32 %v223_v7, 0.0  ;;  %2093 = vmatprep.subr.bf16.mxu0 %v2469_v60 }
 0x121   :  { %v282_v13 = vmax.f32 %v225_v10, 0.0 }
 0x122   :  { %v338_v14 = vpack.c.bf16 %v281_v12, %v279_v6 }
 0x123   :  { %v339_v15 = vpack.c.bf16 %v282_v13, %v280_v9  ;;  %v228_v16 = vpop.f32.mrb[16].mxu0  ;;  %2094 = vmatpush3.bf16.msra.mxu0 %v2470_v11 }
 0x124   :  { %v229_v17 = vadd.f32 %v228_v16, %v2905_v4  ;;  %v230_v18 = vpop.f32.mrb[17].mxu0  ;;  %v2472_v16 = vld [vmem:[%s3489_s5 + $0x30] sm:$0xff]  }
 0x125   :  { %v231_v19 = vadd.f32 %v230_v18, %v2909_v5  ;;  %v232_v20 = vpop.f32.mrb[18].mxu0  ;;  %581 = vmatprep.mubr.bf16.mxu0 %v339_v15  ;;  %v2471_v15 = vld [vmem:[%s3489_s5 + $0x70] sm:$0xff]   ;;  %v2476_v18 = vld [vmem:[%s3491_s7 + $0x8] sm:$0xff]  }
 0x126   :  { %v283_v21 = vmax.f32 %v229_v17, 0.0  ;;  %v233_v22 = vadd.f32 %v232_v20, %v2905_v4  ;;  %v234_v23 = vpop.f32.mrb[19].mxu0  ;;  %582 = vmatmul.mubr.bf16.gmra.mrb[44].mxu0 %v338_v14  ;;  %2095 = vmatprep.subr.bf16.mxu0 %v2471_v15  ;;  %v2475_v17 = vld [vmem:[%s3491_s7] sm:$0xff]   ;;  %v2478_v20 = vld [vmem:[%s3491_s7 + $0x18] sm:$0xff]  }
 0x127   :  { %v284_v24 = vmax.f32 %v231_v19, 0.0  ;;  %v235_v25 = vadd.f32 %v234_v23, %v2909_v5  ;;  %2096 = vmatpush3.bf16.msra.mxu0 %v2472_v16  ;;  %2211 = vmatprep.subr.bf16.mxu1 %v2475_v17  ;;  %v2477_v19 = vld [vmem:[%s3491_s7 + $0x10] sm:$0xff]  }
 0x128   :  { %v285_v26 = vmax.f32 %v233_v22, 0.0 }
 0x129   :  { %v286_v27 = vmax.f32 %v235_v25, 0.0 }
 0x12a   :  { %v340_v28 = vpack.c.bf16 %v285_v26, %v283_v21  ;;  %v331_v21 = vld [vmem:[%s3488_s4] sm:$0x3] }
 0x12b   :  { %v238_v29 = vpop.f32.mrb[20].mxu0  ;;  %v341_v30 = vpack.c.bf16 %v286_v27, %v284_v24  ;;  %v3005_v22 = vrot.slane %v331_v21, %v101_v1  ;;  %v3009_v23 = vrot.slane %v331_v21, %v105_v3 }
 0x12c   :  { %v239_v31 = vadd.f32 %v238_v29, %v2905_v4  ;;  %v240_v32 = vpop.f32.mrb[21].mxu0 }
 0x12d   :  { %v241_v33 = vadd.f32 %v240_v32, %v2909_v5  ;;  %v242_v34 = vpop.f32.mrb[22].mxu0  ;;  %591 = vmatprep.mubr.bf16.mxu1 %v341_v30 }
 0x12e   :  { %v287_v35 = vmax.f32 %v239_v31, 0.0  ;;  %v243_v36 = vadd.f32 %v242_v34, %v2905_v4  ;;  %v244_v37 = vpop.f32.mrb[23].mxu0  ;;  %592 = vmatmul.mubr.bf16.vlgmr.msra.gmra.mrb[0].mxu1 %v340_v28 }
 0x12f   :  { %v288_v38 = vmax.f32 %v241_v33, 0.0  ;;  %v245_v39 = vadd.f32 %v244_v37, %v2909_v5  ;;  %2212 = vmatpush3.bf16.msra.mxu1 %v2475_v17 }
 0x130   :  { %v289_v40 = vmax.f32 %v243_v36, 0.0  ;;  %2213 = vmatprep.subr.bf16.mxu1 %v2476_v18 }
 0x131   :  { %v290_v41 = vmax.f32 %v245_v39, 0.0 }
 0x132   :  { %v342_v42 = vpack.c.bf16 %v289_v40, %v287_v35 }
 0x133   :  { %v343_v43 = vpack.c.bf16 %v290_v41, %v288_v38  ;;  %v248_v44 = vpop.f32.mrb[24].mxu0  ;;  %2214 = vmatpush3.bf16.msra.mxu1 %v2476_v18 }
 0x134   :  { %v249_v45 = vadd.f32 %v248_v44, %v2905_v4  ;;  %v250_v46 = vpop.f32.mrb[25].mxu0  ;;  %2215 = vmatprep.subr.bf16.mxu1 %v2477_v19 }
 0x135   :  { %v251_v47 = vadd.f32 %v250_v46, %v2909_v5  ;;  %v252_v48 = vpop.f32.mrb[26].mxu0  ;;  %601 = vmatprep.mubr.bf16.mxu1 %v343_v43 }
 0x136   :  { %v291_v49 = vmax.f32 %v249_v45, 0.0  ;;  %v253_v50 = vadd.f32 %v252_v48, %v2905_v4  ;;  %v254_v51 = vpop.f32.mrb[27].mxu0  ;;  %602 = vmatmul.mubr.bf16.gmra.mrb[4].mxu1 %v342_v42 }
 0x137   :  { %v292_v52 = vmax.f32 %v251_v47, 0.0  ;;  %v255_v53 = vadd.f32 %v254_v51, %v2909_v5  ;;  %2216 = vmatpush3.bf16.msra.mxu1 %v2477_v19 }
 0x138   :  { %v293_v54 = vmax.f32 %v253_v50, 0.0  ;;  %2217 = vmatprep.subr.bf16.mxu1 %v2478_v20 }
 0x139   :  { %v294_v55 = vmax.f32 %v255_v53, 0.0 }
 0x13a   :  { %v344_v56 = vpack.c.bf16 %v293_v54, %v291_v49 }
 0x13b   :  { %v345_v57 = vpack.c.bf16 %v294_v55, %v292_v52  ;;  %v258_v58 = vpop.f32.mrb[28].mxu0  ;;  %2218 = vmatpush3.bf16.msra.mxu1 %v2478_v20 }
 0x13c   :  { %v259_v59 = vadd.f32 %v258_v58, %v2905_v4  ;;  %v260_v60 = vpop.f32.mrb[29].mxu0 }
 0x13d   :  { %v261_v61 = vadd.f32 %v260_v60, %v2909_v5  ;;  %v262_v2 = vpop.f32.mrb[30].mxu0  ;;  %611 = vmatprep.mubr.bf16.mxu1 %v345_v57 }
 0x13e   :  { %v295_v6 = vmax.f32 %v259_v59, 0.0  ;;  %v263_v7 = vadd.f32 %v262_v2, %v2905_v4  ;;  %v264_v8 = vpop.f32.mrb[31].mxu0  ;;  %612 = vmatmul.mubr.bf16.gmra.mrb[8].mxu1 %v344_v56  ;;  %v2473_v4 = vld [vmem:[%s3489_s5 + $0x78] sm:$0xff]  }
 0x13f   :  { %v296_v9 = vmax.f32 %v261_v61, 0.0  ;;  %v265_v10 = vadd.f32 %v264_v8, %v2909_v5  ;;  %v2474_v5 = vld [vmem:[%s3489_s5 + $0x38] sm:$0xff]   ;;  %2097 = vmatprep.subr.bf16.mxu0 %v2473_v4 }
 0x140   :  { %v297_v11 = vmax.f32 %v263_v7, 0.0  ;;  %2098 = vmatpush3.bf16.msra.mxu0 %v2474_v5 }
 0x141   :  { %v298_v12 = vmax.f32 %v265_v10, 0.0 }
 0x142   :  { %v346_v13 = vpack.c.bf16 %v297_v11, %v295_v6 }
 0x143   :  { %v347_v14 = vpack.c.bf16 %v298_v12, %v296_v9 }
 0x145   :  { %621 = vmatprep.mubr.bf16.mxu1 %v347_v14 }
 0x146   :  { %622 = vmatmul.mubr.bf16.gmra.mrb[12].mxu1 %v346_v13 }
 0x1e1   :  { %v553_v24 = vpop.f32.mrb[32].mxu0 }
 0x1e2   :  { %v554_v25 = vadd.f32 %v553_v24, %v3005_v22  ;;  %v555_v26 = vpop.f32.mrb[33].mxu0 }
 0x1e3   :  { %v556_v27 = vadd.f32 %v555_v26, %v3009_v23  ;;  %v557_v28 = vpop.f32.mrb[34].mxu0 }
 0x1e4   :  { %v558_v29 = vadd.f32 %v557_v28, %v3005_v22  ;;  %v559_v30 = vpop.f32.mrb[35].mxu0  ;;  %v632_v32 = vmax.f32 %v554_v25, 0.0 }
 0x1e5   :  { %v560_v31 = vadd.f32 %v559_v30, %v3009_v23  ;;  %v633_v1 = vmax.f32 %v556_v27, 0.0 }
 0x1e6   :  { %v634_v33 = vmax.f32 %v558_v29, 0.0 }
 0x1e7   :  { %v635_v34 = vmax.f32 %v560_v31, 0.0 }
 0x1e8   :  { %v697_v35 = vpack.c.bf16 %v634_v33, %v632_v32 }
 0x1e9   :  { %v698_v36 = vpack.c.bf16 %v635_v34, %v633_v1  ;;  %v563_v3 = vpop.f32.mrb[36].mxu0 }
 0x1ea   :  { %v564_v37 = vadd.f32 %v563_v3, %v3005_v22  ;;  %v565_v38 = vpop.f32.mrb[37].mxu0 }
 0x1eb   :  { %v566_v39 = vadd.f32 %v565_v38, %v3009_v23  ;;  %v567_v40 = vpop.f32.mrb[38].mxu0  ;;  %847 = vmatprep.mubr.bf16.mxu0 %v698_v36 }
 0x1ec   :  { %v568_v41 = vadd.f32 %v567_v40, %v3005_v22  ;;  %v569_v42 = vpop.f32.mrb[39].mxu0  ;;  %848 = vmatmul.mubr.bf16.vlgmr.msra.gmra.mrb[48].mxu0 %v697_v35  ;;  %v636_v44 = vmax.f32 %v564_v37, 0.0 }
 0x1ed   :  { %v570_v43 = vadd.f32 %v569_v42, %v3009_v23  ;;  %v637_v46 = vmax.f32 %v566_v39, 0.0 }
 0x1ee   :  { %v638_v45 = vmax.f32 %v568_v41, 0.0 }
 0x1ef   :  { %v639_v47 = vmax.f32 %v570_v43, 0.0 }
 0x1f0   :  { %v699_v48 = vpack.c.bf16 %v638_v45, %v636_v44 }
 0x1f1   :  { %v700_v49 = vpack.c.bf16 %v639_v47, %v637_v46  ;;  %v573_v50 = vpop.f32.mrb[40].mxu0 }
 0x1f2   :  { %v574_v51 = vadd.f32 %v573_v50, %v3005_v22  ;;  %v575_v52 = vpop.f32.mrb[41].mxu0 }
 0x1f3   :  { %v576_v53 = vadd.f32 %v575_v52, %v3009_v23  ;;  %v577_v54 = vpop.f32.mrb[42].mxu0  ;;  %855 = vmatprep.mubr.bf16.mxu0 %v700_v49 }
 0x1f4   :  { %v578_v55 = vadd.f32 %v577_v54, %v3005_v22  ;;  %v579_v56 = vpop.f32.mrb[43].mxu0  ;;  %856 = vmatmul.mubr.bf16.gmra.mrb[52].mxu0 %v699_v48  ;;  %v640_v58 = vmax.f32 %v574_v51, 0.0 }
 0x1f5   :  { %v580_v57 = vadd.f32 %v579_v56, %v3009_v23  ;;  %v641_v60 = vmax.f32 %v576_v53, 0.0 }
 0x1f6   :  { %v642_v59 = vmax.f32 %v578_v55, 0.0 }
 0x1f7   :  { %v643_v61 = vmax.f32 %v580_v57, 0.0 }
 0x1f8   :  { %v701_v2 = vpack.c.bf16 %v642_v59, %v640_v58 }
 0x1f9   :  { %v702_v6 = vpack.c.bf16 %v643_v61, %v641_v60  ;;  %v583_v7 = vpop.f32.mrb[44].mxu0 }
 0x1fa   :  { %v584_v8 = vadd.f32 %v583_v7, %v3005_v22  ;;  %v585_v9 = vpop.f32.mrb[45].mxu0 }
 0x1fb   :  { %v586_v10 = vadd.f32 %v585_v9, %v3009_v23  ;;  %v587_v11 = vpop.f32.mrb[46].mxu0  ;;  %863 = vmatprep.mubr.bf16.mxu0 %v702_v6 }
 0x1fc   :  { %v588_v12 = vadd.f32 %v587_v11, %v3005_v22  ;;  %v589_v13 = vpop.f32.mrb[47].mxu0  ;;  %864 = vmatmul.mubr.bf16.gmra.mrb[56].mxu0 %v701_v2  ;;  %v644_v15 = vmax.f32 %v584_v8, 0.0 }
 0x1fd   :  { %v590_v14 = vadd.f32 %v589_v13, %v3009_v23  ;;  %v645_v4 = vmax.f32 %v586_v10, 0.0 }
 0x1fe   :  { %v646_v16 = vmax.f32 %v588_v12, 0.0 }
 0x1ff   :  { %v647_v5 = vmax.f32 %v590_v14, 0.0 }
 0x200   :  { %v703_v17 = vpack.c.bf16 %v646_v16, %v644_v15 }
 0x201   :  { %v704_v18 = vpack.c.bf16 %v647_v5, %v645_v4  ;;  %v593_v19 = vpop.f32.mrb[0].mxu1  ;;  %v2479_v5 = vld [vmem:[%s3491_s7 + $0x20] sm:$0xff]  }
 0x202   :  { %v594_v20 = vadd.f32 %v593_v19, %v3005_v22  ;;  %v595_v21 = vpop.f32.mrb[1].mxu1  ;;  %2219 = vmatprep.subr.bf16.mxu1 %v2479_v5  ;;  %v2484_v19 = vld [vmem:[#allocation4 + $0x8] sm:$0xff]  }
 0x203   :  { %v596_v24 = vadd.f32 %v595_v21, %v3009_v23  ;;  %v597_v25 = vpop.f32.mrb[2].mxu1  ;;  %871 = vmatprep.mubr.bf16.mxu0 %v704_v18  ;;  %2220 = vmatpush3.bf16.msra.mxu1 %v2479_v5  ;;  %v2483_v18 = vld [vmem:[#allocation4] sm:$0xff]   ;;  %v2486_v21 = vld [vmem:[#allocation4 + $0x18] sm:$0xff]  }
 0x204   :  { %v598_v26 = vadd.f32 %v597_v25, %v3005_v22  ;;  %v599_v27 = vpop.f32.mrb[3].mxu1  ;;  %872 = vmatmul.mubr.bf16.gmra.mrb[60].mxu0 %v703_v17  ;;  %v648_v29 = vmax.f32 %v594_v20, 0.0  ;;  %v2482_v17 = vld [vmem:[%s3491_s7 + $0x38] sm:$0xff]   ;;  %2243 = vmatprep.subr.bf16.mxu0 %v2483_v18  ;;  %v2485_v20 = vld [vmem:[#allocation4 + $0x10] sm:$0xff]   ;;  %v2488_v25 = vld [vmem:[#allocation4 + $0x28] sm:$0xff]  }
 0x205   :  { %v600_v28 = vadd.f32 %v599_v27, %v3009_v23  ;;  %v649_v31 = vmax.f32 %v596_v24, 0.0  ;;  %2244 = vmatpush3.bf16.msra.mxu0 %v2483_v18  ;;  %v2487_v24 = vld [vmem:[#allocation4 + $0x20] sm:$0xff]  }
 0x206   :  { %v650_v30 = vmax.f32 %v598_v26, 0.0  ;;  %2245 = vmatprep.subr.bf16.mxu0 %v2484_v19  ;;  %v2489_v26 = vld [vmem:[#allocation4 + $0x30] sm:$0xff]  }
 0x207   :  { %v651_v32 = vmax.f32 %v600_v28, 0.0  ;;  %v3058_v28 = vld [vmem:[%s3490_s6] ss:$0 sm:$0xff] }
 0x208   :  { %v705_v33 = vpack.c.bf16 %v650_v30, %v648_v29 }
 0x209   :  { %v706_v1 = vpack.c.bf16 %v651_v32, %v649_v31  ;;  %v603_v34 = vpop.f32.mrb[4].mxu1  ;;  %2246 = vmatpush3.bf16.msra.mxu0 %v2484_v19 }
 0x20a   :  { %v604_v35 = vadd.f32 %v603_v34, %v3005_v22  ;;  %v605_v36 = vpop.f32.mrb[5].mxu1  ;;  %2247 = vmatprep.subr.bf16.mxu0 %v2485_v20 }
 0x20b   :  { %v606_v3 = vadd.f32 %v605_v36, %v3009_v23  ;;  %v607_v37 = vpop.f32.mrb[6].mxu1  ;;  %879 = vmatprep.mubr.bf16.mxu0 %v706_v1 }
 0x20c   :  { %v608_v38 = vadd.f32 %v607_v37, %v3005_v22  ;;  %v609_v39 = vpop.f32.mrb[7].mxu1  ;;  %880 = vmatmul.mubr.bf16.gmra.mrb[64].mxu0 %v705_v33  ;;  %v652_v41 = vmax.f32 %v604_v35, 0.0 }
 0x20d   :  { %v610_v40 = vadd.f32 %v609_v39, %v3009_v23  ;;  %v653_v43 = vmax.f32 %v606_v3, 0.0  ;;  %2248 = vmatpush3.bf16.msra.mxu0 %v2485_v20 }
 0x20e   :  { %v654_v42 = vmax.f32 %v608_v38, 0.0  ;;  %2249 = vmatprep.subr.bf16.mxu0 %v2486_v21 }
 0x20f   :  { %v655_v44 = vmax.f32 %v610_v40, 0.0 }
 0x210   :  { %v707_v45 = vpack.c.bf16 %v654_v42, %v652_v41 }
 0x211   :  { %v708_v46 = vpack.c.bf16 %v655_v44, %v653_v43  ;;  %v613_v47 = vpop.f32.mrb[8].mxu1  ;;  %2250 = vmatpush3.bf16.msra.mxu0 %v2486_v21 }
 0x212   :  { %v614_v48 = vadd.f32 %v613_v47, %v3005_v22  ;;  %v615_v49 = vpop.f32.mrb[9].mxu1  ;;  %2251 = vmatprep.subr.bf16.mxu0 %v2487_v24 }
 0x213   :  { %v616_v50 = vadd.f32 %v615_v49, %v3009_v23  ;;  %v617_v51 = vpop.f32.mrb[10].mxu1  ;;  %887 = vmatprep.mubr.bf16.mxu0 %v708_v46 }
 0x214   :  { %v618_v52 = vadd.f32 %v617_v51, %v3005_v22  ;;  %v619_v53 = vpop.f32.mrb[11].mxu1  ;;  %888 = vmatmul.mubr.bf16.gmra.mrb[68].mxu0 %v707_v45  ;;  %v656_v55 = vmax.f32 %v614_v48, 0.0 }
 0x215   :  { %v620_v54 = vadd.f32 %v619_v53, %v3009_v23  ;;  %v657_v57 = vmax.f32 %v616_v50, 0.0  ;;  %2252 = vmatpush3.bf16.msra.mxu0 %v2487_v24 }
 0x216   :  { %v658_v56 = vmax.f32 %v618_v52, 0.0  ;;  %2253 = vmatprep.subr.bf16.mxu0 %v2488_v25 }
 0x217   :  { %v659_v58 = vmax.f32 %v620_v54, 0.0 }
 0x218   :  { %v709_v59 = vpack.c.bf16 %v658_v56, %v656_v55 }
 0x219   :  { %v710_v60 = vpack.c.bf16 %v659_v58, %v657_v57  ;;  %v623_v61 = vpop.f32.mrb[12].mxu1  ;;  %2254 = vmatpush3.bf16.msra.mxu0 %v2488_v25 }
 0x21a   :  { %v624_v2 = vadd.f32 %v623_v61, %v3005_v22  ;;  %v625_v6 = vpop.f32.mrb[13].mxu1  ;;  %2255 = vmatprep.subr.bf16.mxu0 %v2489_v26 }
 0x21b   :  { %v626_v7 = vadd.f32 %v625_v6, %v3009_v23  ;;  %v627_v8 = vpop.f32.mrb[14].mxu1  ;;  %895 = vmatprep.mubr.bf16.mxu0 %v710_v60 }
 0x21c   :  { %v628_v9 = vadd.f32 %v627_v8, %v3005_v22  ;;  %v629_v10 = vpop.f32.mrb[15].mxu1  ;;  %896 = vmatmul.mubr.bf16.gmra.mrb[72].mxu0 %v709_v59  ;;  %v660_v12 = vmax.f32 %v624_v2, 0.0  ;;  %v2480_v22 = vld [vmem:[%s3491_s7 + $0x28] sm:$0xff]  }
 0x21d   :  { %v630_v11 = vadd.f32 %v629_v10, %v3009_v23  ;;  %v661_v14 = vmax.f32 %v626_v7, 0.0  ;;  %2221 = vmatprep.subr.bf16.mxu1 %v2480_v22  ;;  %v2481_v23 = vld [vmem:[%s3491_s7 + $0x30] sm:$0xff]   ;;  %2256 = vmatpush3.bf16.msra.mxu0 %v2489_v26 }
 0x21e   :  { %v662_v13 = vmax.f32 %v628_v9, 0.0  ;;  %2222 = vmatpush3.bf16.msra.mxu1 %v2480_v22 }
 0x21f   :  { %v663_v15 = vmax.f32 %v630_v11, 0.0  ;;  %2223 = vmatprep.subr.bf16.mxu1 %v2481_v23 }
 0x220   :  { %v711_v16 = vpack.c.bf16 %v662_v13, %v660_v12 }
 0x221   :  { %v712_v4 = vpack.c.bf16 %v663_v15, %v661_v14 }
 0x222   :  { %2224 = vmatpush3.bf16.msra.mxu1 %v2481_v23 }
 0x223   :  { %903 = vmatprep.mubr.bf16.mxu0 %v712_v4  ;;  %2225 = vmatprep.subr.bf16.mxu1 %v2482_v17 }
 0x224   :  { %904 = vmatmul.mubr.bf16.gmra.mrb[76].mxu0 %v711_v16 }
 0x226   :  { %2226 = vmatpush3.bf16.msra.mxu1 %v2482_v17 }
 0x2bf   :  { %v2099_v27 = vpop.f32.mrb[48].mxu0 }
 0x2c0   :  { %v2100_v29 = vpop.f32.mrb[49].mxu0 }
 0x2c1   :  { %v2101_v30 = vadd.f32 %v2100_v29, %v2099_v27  ;;  %v2102_v31 = vpop.f32.mrb[50].mxu0 }
 0x2c2   :  { %v2103_v32 = vpop.f32.mrb[51].mxu0 }
 0x2c3   :  { %v850_v33 = vadd.f32 %v2101_v30, %v3058_v28  ;;  %v2104_v1 = vadd.f32 %v2103_v32, %v2102_v31 }
 0x2c5   :  { %v853_v34 = vadd.f32 %v2104_v1, %v3058_v28  ;;  %v912_v35 = vmax.f32 %v850_v33, 0.0 }
 0x2c7   :  { %v913_v36 = vmax.f32 %v853_v34, 0.0  ;;  %v2105_v3 = vpop.f32.mrb[52].mxu0 }
 0x2c8   :  { %v2106_v37 = vpop.f32.mrb[53].mxu0 }
 0x2c9   :  { %v2107_v38 = vadd.f32 %v2106_v37, %v2105_v3  ;;  %v2108_v39 = vpop.f32.mrb[54].mxu0  ;;  %v945_v40 = vpack.c.bf16 %v913_v36, %v912_v35 }
 0x2ca   :  { %v2109_v41 = vpop.f32.mrb[55].mxu0 }
 0x2cb   :  { %v858_v42 = vadd.f32 %v2107_v38, %v3058_v28  ;;  %v2110_v43 = vadd.f32 %v2109_v41, %v2108_v39  ;;  %2227 = vmatprep.mubr.bf16.mxu1 %v945_v40 }
 0x2cd   :  { %v861_v44 = vadd.f32 %v2110_v43, %v3058_v28  ;;  %v914_v45 = vmax.f32 %v858_v42, 0.0 }
 0x2cf   :  { %v915_v46 = vmax.f32 %v861_v44, 0.0  ;;  %v2111_v47 = vpop.f32.mrb[56].mxu0 }
 0x2d0   :  { %v2112_v48 = vpop.f32.mrb[57].mxu0 }
 0x2d1   :  { %v946_v49 = vpack.c.bf16 %v915_v46, %v914_v45  ;;  %v2113_v50 = vadd.f32 %v2112_v48, %v2111_v47  ;;  %v2114_v51 = vpop.f32.mrb[58].mxu0 }
 0x2d2   :  { %v2115_v52 = vpop.f32.mrb[59].mxu0 }
 0x2d3   :  { %v866_v53 = vadd.f32 %v2113_v50, %v3058_v28  ;;  %v2116_v54 = vadd.f32 %v2115_v52, %v2114_v51  ;;  %2228 = vmatmul.mubr.bf16.vlgmr.msra.gmra.mrb[16].mxu1 %v946_v49 }
 0x2d5   :  { %v869_v55 = vadd.f32 %v2116_v54, %v3058_v28  ;;  %v916_v56 = vmax.f32 %v866_v53, 0.0  ;;  %v2490_v54 = vld [vmem:[#allocation4 + $0x38] sm:$0xff]  }
 0x2d6   :  { %2257 = vmatprep.subr.bf16.mxu0 %v2490_v54 }
 0x2d7   :  { %v917_v57 = vmax.f32 %v869_v55, 0.0  ;;  %v2117_v58 = vpop.f32.mrb[60].mxu0  ;;  %2258 = vmatpush3.bf16.msra.mxu0 %v2490_v54  ;;  %v2065_v55 = vld [vmem:[%s3492_s8] ss:$0 sm:$0xff] }
 0x2d8   :  { %v2118_v59 = vpop.f32.mrb[61].mxu0 }
 0x2d9   :  { %v2119_v60 = vadd.f32 %v2118_v59, %v2117_v58  ;;  %v2120_v61 = vpop.f32.mrb[62].mxu0  ;;  %v947_v2 = vpack.c.bf16 %v917_v57, %v916_v56 }
 0x2da   :  { %v2121_v6 = vpop.f32.mrb[63].mxu0 }
 0x2db   :  { %v874_v7 = vadd.f32 %v2119_v60, %v3058_v28  ;;  %v2122_v8 = vadd.f32 %v2121_v6, %v2120_v61  ;;  %2231 = vmatprep.mubr.bf16.mxu1 %v947_v2 }
 0x2dd   :  { %v877_v9 = vadd.f32 %v2122_v8, %v3058_v28  ;;  %v918_v10 = vmax.f32 %v874_v7, 0.0 }
 0x2df   :  { %v919_v11 = vmax.f32 %v877_v9, 0.0  ;;  %v2123_v12 = vpop.f32.mrb[64].mxu0 }
 0x2e0   :  { %v2124_v13 = vpop.f32.mrb[65].mxu0 }
 0x2e1   :  { %v2125_v14 = vadd.f32 %v2124_v13, %v2123_v12  ;;  %v2126_v15 = vpop.f32.mrb[66].mxu0  ;;  %v948_v16 = vpack.c.bf16 %v919_v11, %v918_v10 }
 0x2e2   :  { %v2127_v4 = vpop.f32.mrb[67].mxu0 }
 0x2e3   :  { %v882_v5 = vadd.f32 %v2125_v14, %v3058_v28  ;;  %v2128_v22 = vadd.f32 %v2127_v4, %v2126_v15  ;;  %2232 = vmatmul.mubr.bf16.gmra.mrb[20].mxu1 %v948_v16 }
 0x2e5   :  { %v885_v23 = vadd.f32 %v2128_v22, %v3058_v28  ;;  %v920_v17 = vmax.f32 %v882_v5, 0.0 }
 0x2e7   :  { %v921_v18 = vmax.f32 %v885_v23, 0.0  ;;  %v2129_v19 = vpop.f32.mrb[68].mxu0 }
 0x2e8   :  { %v2130_v20 = vpop.f32.mrb[69].mxu0 }
 0x2e9   :  { %v2131_v21 = vadd.f32 %v2130_v20, %v2129_v19  ;;  %v2132_v24 = vpop.f32.mrb[70].mxu0  ;;  %v949_v25 = vpack.c.bf16 %v921_v18, %v920_v17 }
 0x2ea   :  { %v2133_v26 = vpop.f32.mrb[71].mxu0 }
 0x2eb   :  { %v890_v27 = vadd.f32 %v2131_v21, %v3058_v28  ;;  %v2134_v29 = vadd.f32 %v2133_v26, %v2132_v24  ;;  %2235 = vmatprep.mubr.bf16.mxu1 %v949_v25 }
 0x2ed   :  { %v893_v30 = vadd.f32 %v2134_v29, %v3058_v28  ;;  %v922_v31 = vmax.f32 %v890_v27, 0.0 }
 0x2ef   :  { %v923_v32 = vmax.f32 %v893_v30, 0.0  ;;  %v2135_v33 = vpop.f32.mrb[72].mxu0 }
 0x2f0   :  { %v2136_v1 = vpop.f32.mrb[73].mxu0 }
 0x2f1   :  { %v2137_v34 = vadd.f32 %v2136_v1, %v2135_v33  ;;  %v2138_v35 = vpop.f32.mrb[74].mxu0  ;;  %v950_v36 = vpack.c.bf16 %v923_v32, %v922_v31 }
 0x2f2   :  { %v2139_v3 = vpop.f32.mrb[75].mxu0 }
 0x2f3   :  { %v898_v37 = vadd.f32 %v2137_v34, %v3058_v28  ;;  %v2140_v38 = vadd.f32 %v2139_v3, %v2138_v35  ;;  %2236 = vmatmul.mubr.bf16.gmra.mrb[24].mxu1 %v950_v36 }
 0x2f5   :  { %v901_v39 = vadd.f32 %v2140_v38, %v3058_v28  ;;  %v924_v40 = vmax.f32 %v898_v37, 0.0 }
 0x2f7   :  { %v925_v41 = vmax.f32 %v901_v39, 0.0  ;;  %v2141_v42 = vpop.f32.mrb[76].mxu0 }
 0x2f8   :  { %v2142_v43 = vpop.f32.mrb[77].mxu0 }
 0x2f9   :  { %v2143_v44 = vadd.f32 %v2142_v43, %v2141_v42  ;;  %v2144_v45 = vpop.f32.mrb[78].mxu0  ;;  %v951_v46 = vpack.c.bf16 %v925_v41, %v924_v40 }
 0x2fa   :  { %v2145_v47 = vpop.f32.mrb[79].mxu0 }
 0x2fb   :  { %v906_v48 = vadd.f32 %v2143_v44, %v3058_v28  ;;  %v2146_v49 = vadd.f32 %v2145_v47, %v2144_v45  ;;  %2239 = vmatprep.mubr.bf16.mxu1 %v951_v46 }
 0x2fd   :  { %v909_v50 = vadd.f32 %v2146_v49, %v3058_v28  ;;  %v926_v51 = vmax.f32 %v906_v48, 0.0 }
 0x2ff   :  { %v927_v52 = vmax.f32 %v909_v50, 0.0 }
 0x301   :  { %v952_v53 = vpack.c.bf16 %v927_v52, %v926_v51  ;;  %v2074_v51 = vld [vmem:[%s3494_s10] ss:$0 sm:$0xff] }
 0x303   :  { %2240 = vmatmul.mubr.bf16.gmra.mrb[28].mxu1 %v952_v53 }
 0x3a6   :  { %v2229_v56 = vpop.f32.mrb[16].mxu1 }
 0x3a7   :  { %v1050_v57 = vadd.f32 %v2229_v56, %v2065_v55  ;;  %v1041_v58 = vpop.f32.mrb[17].mxu1 }
 0x3a8   :  { %v1042_v59 = vadd.f32 %v2065_v55, %v1041_v58  ;;  %v2230_v60 = vpop.f32.mrb[18].mxu1 }
 0x3a9   :  { %v1053_v61 = vadd.f32 %v2230_v60, %v2065_v55  ;;  %v1044_v2 = vpop.f32.mrb[19].mxu1  ;;  %v1106_v28 = vmax.f32 %v1050_v57, 0.0 }
 0x3aa   :  { %v1045_v6 = vadd.f32 %v2065_v55, %v1044_v2  ;;  %v1104_v8 = vmax.f32 %v1042_v59, 0.0 }
 0x3ab   :  { %v1107_v7 = vmax.f32 %v1053_v61, 0.0 }
 0x3ac   :  { %v1105_v9 = vmax.f32 %v1045_v6, 0.0 }
 0x3ad   :  { %v1138_v10 = vpack.c.bf16 %v1107_v7, %v1106_v28 }
 0x3ae   :  { %v1137_v11 = vpack.c.bf16 %v1105_v9, %v1104_v8 }
 0x3b0   :  { %2259 = vmatprep.mubr.bf16.mxu0 %v1137_v11 }
 0x3b1   :  { %2260 = vmatmul.mubr.bf16.vlgmr.msra.gmra.mrb[80].mxu0 %v1138_v10 }
 0x3b6   :  { %v2233_v12 = vpop.f32.mrb[20].mxu1 }
 0x3b7   :  { %v1066_v13 = vadd.f32 %v2233_v12, %v2065_v55  ;;  %v1057_v14 = vpop.f32.mrb[21].mxu1 }
 0x3b8   :  { %v1058_v15 = vadd.f32 %v2065_v55, %v1057_v14  ;;  %v2234_v16 = vpop.f32.mrb[22].mxu1 }
 0x3b9   :  { %v1069_v4 = vadd.f32 %v2234_v16, %v2065_v55  ;;  %v1060_v5 = vpop.f32.mrb[23].mxu1  ;;  %v1110_v23 = vmax.f32 %v1066_v13, 0.0 }
 0x3ba   :  { %v1061_v22 = vadd.f32 %v2065_v55, %v1060_v5  ;;  %v1108_v18 = vmax.f32 %v1058_v15, 0.0 }
 0x3bb   :  { %v1111_v17 = vmax.f32 %v1069_v4, 0.0 }
 0x3bc   :  { %v1109_v19 = vmax.f32 %v1061_v22, 0.0 }
 0x3bd   :  { %v1140_v20 = vpack.c.bf16 %v1111_v17, %v1110_v23 }
 0x3be   :  { %v1139_v21 = vpack.c.bf16 %v1109_v19, %v1108_v18 }
 0x3c0   :  { %2263 = vmatprep.mubr.bf16.mxu0 %v1139_v21 }
 0x3c1   :  { %2264 = vmatmul.mubr.bf16.gmra.mrb[84].mxu0 %v1140_v20 }
 0x3c6   :  { %v2237_v24 = vpop.f32.mrb[24].mxu1 }
 0x3c7   :  { %v1082_v25 = vadd.f32 %v2237_v24, %v2065_v55  ;;  %v1073_v26 = vpop.f32.mrb[25].mxu1 }
 0x3c8   :  { %v1074_v27 = vadd.f32 %v2065_v55, %v1073_v26  ;;  %v2238_v29 = vpop.f32.mrb[26].mxu1 }
 0x3c9   :  { %v1085_v30 = vadd.f32 %v2238_v29, %v2065_v55  ;;  %v1076_v31 = vpop.f32.mrb[27].mxu1  ;;  %v1114_v33 = vmax.f32 %v1082_v25, 0.0 }
 0x3ca   :  { %v1077_v32 = vadd.f32 %v2065_v55, %v1076_v31  ;;  %v1112_v34 = vmax.f32 %v1074_v27, 0.0 }
 0x3cb   :  { %v1115_v1 = vmax.f32 %v1085_v30, 0.0 }
 0x3cc   :  { %v1113_v35 = vmax.f32 %v1077_v32, 0.0 }
 0x3cd   :  { %v1142_v36 = vpack.c.bf16 %v1115_v1, %v1114_v33 }
 0x3ce   :  { %v1141_v3 = vpack.c.bf16 %v1113_v35, %v1112_v34 }
 0x3d0   :  { %2267 = vmatprep.mubr.bf16.mxu0 %v1141_v3 }
 0x3d1   :  { %2268 = vmatmul.mubr.bf16.gmra.mrb[88].mxu0 %v1142_v36 }
 0x3d6   :  { %v2241_v37 = vpop.f32.mrb[28].mxu1 }
 0x3d7   :  { %v1098_v38 = vadd.f32 %v2241_v37, %v2065_v55  ;;  %v1089_v39 = vpop.f32.mrb[29].mxu1 }
 0x3d8   :  { %v1090_v40 = vadd.f32 %v2065_v55, %v1089_v39  ;;  %v2242_v41 = vpop.f32.mrb[30].mxu1 }
 0x3d9   :  { %v1101_v42 = vadd.f32 %v2242_v41, %v2065_v55  ;;  %v1092_v43 = vpop.f32.mrb[31].mxu1  ;;  %v1118_v45 = vmax.f32 %v1098_v38, 0.0 }
 0x3da   :  { %v1093_v44 = vadd.f32 %v2065_v55, %v1092_v43  ;;  %v1116_v47 = vmax.f32 %v1090_v40, 0.0 }
 0x3db   :  { %v1119_v46 = vmax.f32 %v1101_v42, 0.0 }
 0x3dc   :  { %v1117_v48 = vmax.f32 %v1093_v44, 0.0 }
 0x3dd   :  { %v1144_v49 = vpack.c.bf16 %v1119_v46, %v1118_v45 }
 0x3de   :  { %v1143_v50 = vpack.c.bf16 %v1117_v48, %v1116_v47 }
 0x3e0   :  { %2271 = vmatprep.mubr.bf16.mxu0 %v1143_v50 }
 0x3e1   :  { %2272 = vmatmul.mubr.bf16.gmra.mrb[92].mxu0 %v1144_v49 }
 0x484   :  { %v2261_v52 = vpop.f32.mrb[80].mxu0 }
 0x485   :  { %v3082_v53 = vadd.f32 %v2261_v52, %v2074_v51  ;;  %v1233_v54 = vpop.f32.mrb[81].mxu0 }
 0x486   :  { %v3084_v56 = vadd.f32 %v2074_v51, %v1233_v54  ;;  %v2262_v57 = vpop.f32.mrb[82].mxu0 }
 0x487   :  { %v3086_v55 = vadd.f32 %v2262_v57, %v2074_v51  ;;  %v1236_v58 = vpop.f32.mrb[83].mxu0  ;;  %v1298_v59 = vmul.f32 %v3082_v53, %v3082_v53 }
 0x488   :  { %v3090_v60 = vadd.f32 %v2074_v51, %v1236_v58  ;;  %v1296_v61 = vmul.f32 %v3084_v56, %v3084_v56 }
 0x489   :  { %1316 = vadd.xlane.f32.xlu1 %v1298_v59  ;;  %v1299_v2 = vmul.f32 %v3086_v55, %v3086_v55 }
 0x48a   :  { %1312 = vadd.xlane.f32.xlu0 %v1296_v61  ;;  %v1297_v6 = vmul.f32 %v3090_v60, %v3090_v60 }
 0x48d   :  { %1318 = vadd.xlane.f32.xlu1 %v1299_v2 }
 0x48e   :  { %1314 = vadd.xlane.f32.xlu0 %v1297_v6 }
 0x494   :  { %v2265_v28 = vpop.f32.mrb[84].mxu0 }
 0x495   :  { %v1249_v7 = vpop.f32.mrb[85].mxu0  ;;  %v3100_v11 = vadd.f32 %v2265_v28, %v2074_v51 }
 0x496   :  { %v3098_v8 = vadd.f32 %v2074_v51, %v1249_v7  ;;  %v2266_v9 = vpop.f32.mrb[86].mxu0 }
 0x497   :  { %v1252_v10 = vpop.f32.mrb[87].mxu0  ;;  %v3106_v14 = vadd.f32 %v2266_v9, %v2074_v51  ;;  %v1302_v16 = vmul.f32 %v3100_v11, %v3100_v11 }
 0x498   :  { %v3102_v12 = vadd.f32 %v2074_v51, %v1252_v10  ;;  %v1300_v13 = vmul.f32 %v3098_v8, %v3098_v8 }
 0x499   :  { %v1303_v4 = vmul.f32 %v3106_v14, %v3106_v14 }
 0x49a   :  { %1320 = vadd.xlane.f32.xlu0 %v1300_v13  ;;  %v1301_v15 = vmul.f32 %v3102_v12, %v3102_v12 }
 0x49c   :  { %1322 = vadd.xlane.f32.xlu1 %v1301_v15 }
 0x49e   :  { %1324 = vadd.xlane.f32.xlu0 %v1302_v16 }
 0x4a0   :  { %1326 = vadd.xlane.f32.xlu1 %v1303_v4 }
 0x4a4   :  { %v2269_v5 = vpop.f32.mrb[88].mxu0 }
 0x4a5   :  { %v1265_v22 = vpop.f32.mrb[89].mxu0  ;;  %v3116_v19 = vadd.f32 %v2269_v5, %v2074_v51 }
 0x4a6   :  { %v3114_v23 = vadd.f32 %v2074_v51, %v1265_v22  ;;  %v2270_v17 = vpop.f32.mrb[90].mxu0 }
 0x4a7   :  { %v1268_v18 = vpop.f32.mrb[91].mxu0  ;;  %v3122_v24 = vadd.f32 %v2270_v17, %v2074_v51  ;;  %v1306_v26 = vmul.f32 %v3116_v19, %v3116_v19 }
 0x4a8   :  { %v3118_v20 = vadd.f32 %v2074_v51, %v1268_v18  ;;  %v1304_v21 = vmul.f32 %v3114_v23, %v3114_v23 }
 0x4a9   :  { %v1307_v27 = vmul.f32 %v3122_v24, %v3122_v24 }
 0x4aa   :  { %1328 = vadd.xlane.f32.xlu0 %v1304_v21  ;;  %v1305_v25 = vmul.f32 %v3118_v20, %v3118_v20 }
 0x4ac   :  { %1330 = vadd.xlane.f32.xlu1 %v1305_v25 }
 0x4ae   :  { %1332 = vadd.xlane.f32.xlu0 %v1306_v26 }
 0x4b0   :  { %1334 = vadd.xlane.f32.xlu1 %v1307_v27 }
 0x4b4   :  { %v2273_v29 = vpop.f32.mrb[92].mxu0 }
 0x4b5   :  { %v1281_v30 = vpop.f32.mrb[93].mxu0  ;;  %v3132_v1 = vadd.f32 %v2273_v29, %v2074_v51 }
 0x4b6   :  { %v3130_v31 = vadd.f32 %v2074_v51, %v1281_v30  ;;  %v2274_v32 = vpop.f32.mrb[94].mxu0 }
 0x4b7   :  { %v1284_v33 = vpop.f32.mrb[95].mxu0  ;;  %v3138_v36 = vadd.f32 %v2274_v32, %v2074_v51  ;;  %v1310_v37 = vmul.f32 %v3132_v1, %v3132_v1 }
 0x4b8   :  { %v3134_v34 = vadd.f32 %v2074_v51, %v1284_v33  ;;  %v1308_v35 = vmul.f32 %v3130_v31, %v3130_v31 }
 0x4b9   :  { %v1311_v38 = vmul.f32 %v3138_v36, %v3138_v36 }
 0x4ba   :  { %1336 = vadd.xlane.f32.xlu0 %v1308_v35  ;;  %v1309_v3 = vmul.f32 %v3134_v34, %v3134_v34 }
 0x4bc   :  { %1338 = vadd.xlane.f32.xlu1 %v1309_v3 }
 0x4be   :  { %1340 = vadd.xlane.f32.xlu0 %v1310_v37 }
 0x4c0   :  { %1342 = vadd.xlane.f32.xlu1 %v1311_v38 }
 0x516   :  { %v1317_v39 = vpop.xlane.xlu1 %1316 }
 0x517   :  { %v1346_v40 = vmax.f32 %v1317_v39, 1e-24  ;;  %v1313_v41 = vpop.xlane.xlu0 %1312 }
 0x518   :  { %v1344_v42 = vmax.f32 %v1313_v41, 1e-24 }
 0x519   :  { %2491 = vrsqrt.f32 %v1346_v40 }
 0x51a   :  { %2493 = vrsqrt.f32 %v1344_v42  ;;  %v1319_v43 = vpop.xlane.xlu1 %1318 }
 0x51b   :  { %v1347_v44 = vmax.f32 %v1319_v43, 1e-24  ;;  %v1315_v45 = vpop.xlane.xlu0 %1314 }
 0x51c   :  { %v1345_v46 = vmax.f32 %v1315_v45, 1e-24 }
 0x51d   :  { %2495 = vrsqrt.f32 %v1347_v44 }
 0x51e   :  { %2497 = vrsqrt.f32 %v1345_v46 }
 0x523   :  { %v2492_v47 = vpop.eup %2491 }
 0x524   :  { %v2494_v48 = vpop.eup %2493  ;;  %v3147_v49 = vmul.f32 %v2492_v47, %v3082_v53 }
 0x525   :  { %v1376_v50 = vmul.f32 %v2494_v48, %v3084_v56 }
 0x526   :  { %1980 = vst [vmem:[%s3496_s12 + $0x10] sm:$0xff] %v3147_v49 }
 0x527   :  { %v2496_v51 = vpop.eup %2495  ;;  %2307 = vmatprep.mubr.f32.mxu1 %v1376_v50  ;;  %1978 = vst [vmem:[%s3496_s12] sm:$0xff] %v1376_v50  ;;  %v1321_v52 = vpop.xlane.xlu0 %1320 }
 0x528   :  { %v2498_v54 = vpop.eup %2497  ;;  %v1348_v57 = vmax.f32 %v1321_v52, 1e-24  ;;  %v3158_v58 = vmul.f32 %v2496_v51, %v3086_v55 }
 0x529   :  { %v1323_v53 = vpop.xlane.xlu1 %1322  ;;  %v3161_v56 = vmul.f32 %v2498_v54, %v3090_v60 }
 0x52a   :  { %2499 = vrsqrt.f32 %v1348_v57  ;;  %v1349_v59 = vmax.f32 %v1323_v53, 1e-24  ;;  %1981 = vst [vmem:[%s3496_s12 + $0x18] sm:$0xff] %v3158_v58  ;;  %v2335_v60 = vpack.c.bf16 %v3158_v58, %v3147_v49  ;;  %v1541_v53 = vadd.s32 24, %v2896_v63 }
 0x52b   :  { %v1325_v61 = vpop.xlane.xlu0 %1324  ;;  %v2331_v2 = vpack.c.bf16 %v3161_v56, %v1376_v50  ;;  %1979 = vst [vmem:[%s3496_s12 + $0x8] sm:$0xff] %v3161_v56 }
 0x52c   :  { %2501 = vrsqrt.f32 %v1349_v59  ;;  %v1350_v55 = vmax.f32 %v1325_v61, 1e-24 }
 0x52d   :  { %v1327_v6 = vpop.xlane.xlu1 %1326  ;;  %2332 = vmatprep.subr.bf16.mxu1 %v2331_v2 }
 0x52e   :  { %2503 = vrsqrt.f32 %v1350_v55  ;;  %v1351_v28 = vmax.f32 %v1327_v6, 1e-24  ;;  %2334 = vmatpush3.bf16.xpose.msra.mxu1 %v2331_v2  ;;  %v1543_v55 = vadd.s32 40, %v2896_v63 }
 0x52f   :  { %2336 = vmatprep.subr.bf16.mxu1 %v2335_v60 }
 0x530   :  { %2505 = vrsqrt.f32 %v1351_v28  ;;  %v1544_v28 = vadd.s32 48, %v2896_v63 }
 0x534   :  { %v2500_v7 = vpop.eup %2499 }
 0x535   :  { %v3175_v9 = vmul.f32 %v2500_v7, %v3098_v8 }
 0x536   :  { %v2502_v10 = vpop.eup %2501  ;;  %2338 = vmatpush3.bf16.xpose.msra.mxu1 %v2335_v60 }
 0x537   :  { %v1329_v13 = vpop.xlane.xlu0 %1328  ;;  %v3178_v15 = vmul.f32 %v2502_v10, %v3102_v12  ;;  %1982 = vst [vmem:[%s3496_s12 + $0x20] sm:$0xff] %v3175_v9 }
 0x538   :  { %v2504_v16 = vpop.eup %2503  ;;  %v1352_v4 = vmax.f32 %v1329_v13, 1e-24 }
 0x539   :  { %v1331_v5 = vpop.xlane.xlu1 %1330  ;;  %v2339_v22 = vpack.c.bf16 %v3178_v15, %v3175_v9  ;;  %1983 = vst [vmem:[%s3496_s12 + $0x28] sm:$0xff] %v3178_v15  ;;  %v3191_v8 = vmul.f32 %v2504_v16, %v3100_v11 }
 0x53a   :  { %v2506_v12 = vpop.eup %2505  ;;  %2507 = vrsqrt.f32 %v1352_v4  ;;  %v1353_v17 = vmax.f32 %v1331_v5, 1e-24  ;;  %v1546_v5 = vadd.s32 64, %v2896_v63 }
 0x53b   :  { %2340 = vmatprep.subr.bf16.mxu1 %v2339_v22  ;;  %v1333_v18 = vpop.xlane.xlu0 %1332  ;;  %v3194_v21 = vmul.f32 %v2506_v12, %v3106_v14  ;;  %1984 = vst [vmem:[%s3496_s12 + $0x30] sm:$0xff] %v3191_v8 }
 0x53c   :  { %2509 = vrsqrt.f32 %v1353_v17  ;;  %v1354_v25 = vmax.f32 %v1333_v18, 1e-24  ;;  %v1547_v18 = vadd.s32 72, %v2896_v63 }
 0x53d   :  { %v1335_v26 = vpop.xlane.xlu1 %1334  ;;  %v2343_v11 = vpack.c.bf16 %v3194_v21, %v3191_v8  ;;  %1985 = vst [vmem:[%s3496_s12 + $0x38] sm:$0xff] %v3194_v21 }
 0x53e   :  { %2511 = vrsqrt.f32 %v1354_v25  ;;  %v1355_v27 = vmax.f32 %v1335_v26, 1e-24  ;;  %2342 = vmatpush3.bf16.xpose.msra.mxu1 %v2339_v22  ;;  %v1548_v26 = vadd.s32 80, %v2896_v63 }
 0x53f   :  { %2344 = vmatprep.subr.bf16.mxu1 %v2343_v11 }
 0x540   :  { %2513 = vrsqrt.f32 %v1355_v27 }
 0x544   :  { %v2508_v14 = vpop.eup %2507 }
 0x545   :  { %v1384_v29 = vmul.f32 %v2508_v14, %v3114_v23 }
 0x546   :  { %v2510_v30 = vpop.eup %2509  ;;  %2346 = vmatpush3.bf16.xpose.msra.mxu1 %v2343_v11 }
 0x547   :  { %v1337_v32 = vpop.xlane.xlu0 %1336  ;;  %v1385_v33 = vmul.f32 %v2510_v30, %v3118_v20  ;;  %1986 = vst [vmem:[%s3496_s12 + $0x40] sm:$0xff] %v1384_v29  ;;  %v1549_v30 = vadd.s32 88, %v2896_v63 }
 0x548   :  { %v2512_v35 = vpop.eup %2511  ;;  %v1356_v3 = vmax.f32 %v1337_v32, 1e-24 }
 0x549   :  { %v1339_v37 = vpop.xlane.xlu1 %1338  ;;  %v2347_v38 = vpack.c.bf16 %v1385_v33, %v1384_v29  ;;  %1987 = vst [vmem:[%s3496_s12 + $0x48] sm:$0xff] %v1385_v33  ;;  %v1386_v39 = vmul.f32 %v2512_v35, %v3116_v19  ;;  %v1550_v35 = vadd.s32 96, %v2896_v63 }
 0x54a   :  { %v2514_v23 = vpop.eup %2513  ;;  %2515 = vrsqrt.f32 %v1356_v3  ;;  %v1357_v40 = vmax.f32 %v1339_v37, 1e-24 }
 0x54b   :  { %2348 = vmatprep.subr.bf16.mxu1 %v2347_v38  ;;  %v1341_v41 = vpop.xlane.xlu0 %1340  ;;  %v1387_v20 = vmul.f32 %v2514_v23, %v3122_v24  ;;  %1988 = vst [vmem:[%s3496_s12 + $0x50] sm:$0xff] %v1386_v39  ;;  %v1551_v23 = vadd.s32 104, %v2896_v63 }
 0x54c   :  { %2517 = vrsqrt.f32 %v1357_v40  ;;  %v1358_v42 = vmax.f32 %v1341_v41, 1e-24 }
 0x54d   :  { %v1343_v43 = vpop.xlane.xlu1 %1342  ;;  %v2351_v44 = vpack.c.bf16 %v1387_v20, %v1386_v39  ;;  %1989 = vst [vmem:[%s3496_s12 + $0x58] sm:$0xff] %v1387_v20 }
 0x54e   :  { %2519 = vrsqrt.f32 %v1358_v42  ;;  %v1359_v19 = vmax.f32 %v1343_v43, 1e-24  ;;  %2350 = vmatpush3.bf16.xpose.msra.mxu1 %v2347_v38 }
 0x54f   :  { %2352 = vmatprep.subr.bf16.mxu1 %v2351_v44 }
 0x550   :  { %2521 = vrsqrt.f32 %v1359_v19 }
 0x554   :  { %v2516_v45 = vpop.eup %2515 }
 0x555   :  { %v1388_v24 = vmul.f32 %v2516_v45, %v3130_v31  ;;  %v1553_v45 = vadd.s32 120, %v2896_v63 }
 0x556   :  { %v2518_v46 = vpop.eup %2517  ;;  %2354 = vmatpush3.bf16.xpose.msra.mxu1 %v2351_v44 }
 0x557   :  { %v1389_v47 = vmul.f32 %v2518_v46, %v3134_v34  ;;  %1990 = vst [vmem:[%s3496_s12 + $0x60] sm:$0xff] %v1388_v24 }
 0x558   :  { %v2520_v48 = vpop.eup %2519 }
 0x559   :  { %v2355_v50 = vpack.c.bf16 %v1389_v47, %v1388_v24  ;;  %1991 = vst [vmem:[%s3496_s12 + $0x68] sm:$0xff] %v1389_v47  ;;  %v1390_v51 = vmul.f32 %v2520_v48, %v3132_v1  ;;  %v1539_v1 = vadd.s32 8, %v2896_v63 }
 0x55a   :  { %v2522_v52 = vpop.eup %2521 }
 0x55b   :  { %2356 = vmatprep.subr.bf16.mxu1 %v2355_v50  ;;  %v1391_v31 = vmul.f32 %v2522_v52, %v3138_v36  ;;  %1992 = vst [vmem:[%s3496_s12 + $0x70] sm:$0xff] %v1390_v51  ;;  %v3247_v36 = vand.u32 127, %v99_v62  ;;  %v1542_v62 = vadd.s32 32, %v2896_v63 }
 0x55d   :  { %v2359_v34 = vpack.c.bf16 %v1391_v31, %v1390_v51  ;;  %1993 = vst [vmem:[%s3496_s12 + $0x78] sm:$0xff] %v1391_v31  ;;  %vm1557_vm1 = vcmp.eq.s32.totalorder %v1539_v1, %v3247_v36  ;;  %vm1556_vm2 = vcmp.eq.s32.totalorder %v2896_v63, %v3247_v36  ;;  %vm1559_vm4 = vcmp.eq.s32.totalorder %v1541_v53, %v3247_v36 }
 0x55e   :  { %2358 = vmatpush3.bf16.xpose.msra.mxu1 %v2355_v50  ;;  %vm1560_vm5 = vcmp.eq.s32.totalorder %v1542_v62, %v3247_v36  ;;  %vm1561_vm6 = vcmp.eq.s32.totalorder %v1543_v55, %v3247_v36  ;;  %vm1562_vm7 = vcmp.eq.s32.totalorder %v1544_v28, %v3247_v36  ;;  %vm1564_vm9 = vcmp.eq.s32.totalorder %v1546_v5, %v3247_v36 }
 0x55f   :  { %2360 = vmatprep.subr.bf16.mxu1 %v2359_v34  ;;  %vm1565_vm10 = vcmp.eq.s32.totalorder %v1547_v18, %v3247_v36  ;;  %vm1566_vm11 = vcmp.eq.s32.totalorder %v1548_v26, %v3247_v36  ;;  %vm1567_vm12 = vcmp.eq.s32.totalorder %v1549_v30, %v3247_v36  ;;  %vm1568_vm13 = vcmp.eq.s32.totalorder %v1550_v35, %v3247_v36 }
 0x560   :  { %vm1569_vm14 = vcmp.eq.s32.totalorder %v1551_v23, %v3247_v36  ;;  %vm1571_vm0 = vcmp.eq.s32.totalorder %v1553_v45, %v3247_v36 }
 0x566   :  { %2362 = vmatpush3.bf16.xpose.msra.mxu1 %v2359_v34 }
 0x56d   :  { %2308 = vmatmul.mubr.f32.vlgmr.msra.gmra.mrb[32].mxu1 %v3161_v56 }
 0x56e   :  { %2310 = vmatprep.mubr.f32.mxu1 %v3147_v49  ;;  %v1540_v49 = vadd.s32 16, %v2896_v63 }
 0x570   :  { %vm1558_vm3 = vcmp.eq.s32.totalorder %v1540_v49, %v3247_v36 }
 0x571   :  { %2311 = vmatmul.mubr.f32.gmra.mrb[34].mxu1 %v3158_v58 }
 0x572   :  { %2313 = vmatprep.mubr.f32.mxu1 %v3175_v9 }
 0x575   :  { %2314 = vmatmul.mubr.f32.gmra.mrb[36].mxu1 %v3178_v15  ;;  %v1545_v15 = vadd.s32 56, %v2896_v63 }
 0x576   :  { %2316 = vmatprep.mubr.f32.mxu1 %v3191_v8 }
 0x577   :  { %vm1563_vm8 = vcmp.eq.s32.totalorder %v1545_v15, %v3247_v36 }
 0x579   :  { %2317 = vmatmul.mubr.f32.gmra.mrb[38].mxu1 %v3194_v21 }
 0x57a   :  { %2319 = vmatprep.mubr.f32.mxu1 %v1384_v29 }
 0x57d   :  { %2320 = vmatmul.mubr.f32.gmra.mrb[40].mxu1 %v1385_v33 }
 0x57e   :  { %2322 = vmatprep.mubr.f32.mxu1 %v1386_v39 }
 0x581   :  { %2323 = vmatmul.mubr.f32.gmra.mrb[42].mxu1 %v1387_v20  ;;  %v1552_v20 = vadd.s32 112, %v2896_v63 }
 0x582   :  { %2325 = vmatprep.mubr.f32.mxu1 %v1388_v24 }
 0x583   :  { %vm1570_vm15 = vcmp.eq.s32.totalorder %v1552_v20, %v3247_v36 }
 0x585   :  { %2326 = vmatmul.mubr.f32.gmra.mrb[44].mxu1 %v1389_v47 }
 0x586   :  { %2328 = vmatprep.mubr.f32.mxu1 %v1390_v51 }
 0x589   :  { %2329 = vmatmul.mubr.f32.gmra.mrb[46].mxu1 %v1391_v31 }
 0x640   :  { %v3253_v54 = vpop.f32.mrb[32].mxu1 }
 0x641   :  { %v1573_v57 = vsel %vm1557_vm1, %v3253_v54, 0.0  ;;  %v3256_v58 = vpop.f32.mrb[33].mxu1 }
 0x642   :  { %v1572_v56 = vsel %vm1556_vm2, %v3256_v58, 0.0 }
 0x643   :  { %v1588_v59 = vadd.f32 %v1573_v57, %v1572_v56 }
 0x644   :  { %v3262_v61 = vpop.f32.mrb[34].mxu1 }
 0x645   :  { %v3265_v2 = vpop.f32.mrb[35].mxu1  ;;  %v1575_v7 = vsel %vm1559_vm4, %v3262_v61, 0.0 }
 0x646   :  { %v1574_v6 = vsel %vm1558_vm3, %v3265_v2, 0.0 }
 0x647   :  { %v1589_v60 = vadd.f32 %v1588_v59, %v1574_v6 }
 0x648   :  { %v3272_v9 = vpop.f32.mrb[36].mxu1 }
 0x649   :  { %v3275_v10 = vpop.f32.mrb[37].mxu1  ;;  %v1590_v13 = vadd.f32 %v1589_v60, %v1575_v7  ;;  %v1577_v22 = vsel %vm1561_vm6, %v3272_v9, 0.0 }
 0x64a   :  { %v1576_v16 = vsel %vm1560_vm5, %v3275_v10, 0.0 }
 0x64b   :  { %v1591_v4 = vadd.f32 %v1590_v13, %v1576_v16 }
 0x64c   :  { %v3282_v8 = vpop.f32.mrb[38].mxu1 }
 0x64d   :  { %v3285_v12 = vpop.f32.mrb[39].mxu1  ;;  %v1592_v17 = vadd.f32 %v1591_v4, %v1577_v22  ;;  %v1579_v11 = vsel %vm1563_vm8, %v3282_v8, 0.0 }
 0x64e   :  { %v1578_v21 = vsel %vm1562_vm7, %v3285_v12, 0.0 }
 0x64f   :  { %v1593_v25 = vadd.f32 %v1592_v17, %v1578_v21 }
 0x650   :  { %v3292_v27 = vpop.f32.mrb[40].mxu1 }
 0x651   :  { %v3295_v14 = vpop.f32.mrb[41].mxu1  ;;  %v1594_v29 = vadd.f32 %v1593_v25, %v1579_v11  ;;  %v1581_v3 = vsel %vm1565_vm10, %v3292_v27, 0.0  ;;  %v1737_v25 = vmul.f32 2.0, %v3256_v58 }
 0x652   :  { %v1580_v32 = vsel %vm1564_vm9, %v3295_v14, 0.0 }
 0x653   :  { %v1595_v33 = vadd.f32 %v1594_v29, %v1580_v32 }
 0x654   :  { %v3302_v37 = vpop.f32.mrb[42].mxu1 }
 0x655   :  { %v3305_v38 = vpop.f32.mrb[43].mxu1  ;;  %v1596_v39 = vadd.f32 %v1595_v33, %v1581_v3  ;;  %v1583_v42 = vsel %vm1567_vm12, %v3302_v37, 0.0  ;;  %v1738_v33 = vmul.f32 2.0, %v3253_v54 }
 0x656   :  { %v1582_v40 = vsel %vm1566_vm11, %v3305_v38, 0.0 }
 0x657   :  { %v1597_v41 = vadd.f32 %v1596_v39, %v1582_v40  ;;  %v1739_v39 = vmul.f32 2.0, %v3265_v2 }
 0x658   :  { %v3312_v43 = vpop.f32.mrb[44].mxu1 }
 0x659   :  { %v3315_v44 = vpop.f32.mrb[45].mxu1  ;;  %v1598_v19 = vadd.f32 %v1597_v41, %v1583_v42  ;;  %v1585_v47 = vsel %vm1569_vm14, %v3312_v43, 0.0 }
 0x65a   :  { %v1584_v24 = vsel %vm1568_vm13, %v3315_v44, 0.0 }
 0x65b   :  { %v1599_v46 = vadd.f32 %v1598_v19, %v1584_v24  ;;  %v1740_v19 = vmul.f32 2.0, %v3262_v61 }
 0x65c   :  { %v3321_v48 = vpop.f32.mrb[46].mxu1 }
 0x65d   :  { %v3324_v50 = vpop.f32.mrb[47].mxu1  ;;  %v1600_v51 = vadd.f32 %v1599_v46, %v1585_v47  ;;  %v1587_v34 = vsel %vm1571_vm0, %v3321_v48, 0.0  ;;  %v1741_v46 = vmul.f32 2.0, %v3275_v10 }
 0x65e   :  { %v1586_v52 = vsel %vm1570_vm15, %v3324_v50, 0.0 }
 0x65f   :  { %v1601_v31 = vadd.f32 %v1600_v51, %v1586_v52 }
 0x661   :  { %v1602_v63 = vadd.f32 %v1601_v31, %v1587_v34 }
 0x663   :  { %v1603_v1 = vrot.slane %v1602_v63, 4 }
 0x665   :  { %v1604_v49 = vadd.f32 %v1603_v1, %v1602_v63 }
 0x667   :  { %v1605_v57 = vrot.slane %v1604_v49, 2 }
 0x669   :  { %v1606_v53 = vadd.f32 %v1605_v57, %v1604_v49 }
 0x66b   :  { %v1607_v56 = vrot.slane %v1606_v53, 1 }
 0x66d   :  { %v3328_v59 = vadd.f32 %v1607_v56, %v1606_v53  ;;  %v1742_v53 = vmul.f32 2.0, %v3272_v9 }
 0x66f   :  { %1609 = vxpose.xlu0.b32.start.end [1/1] (short) %v3328_v59, 128 }
 0x698   :  { %2404 = vset.pattern.permute.xlu0 %v2641_v0 }
 0x6ef   :  { %v1625_v36 = vpop.trf.xlu0 }
 0x6f0   :  { %1643 = vperm.xlu1 %2403, %v1625_v36  }
 0x6f3   :  { %v1626_v62 = vpop.trf.xlu0 }
 0x6f4   :  { %1648 = vperm.xlu1 %2403, %v1626_v62  }
 0x6f7   :  { %v1627_v55 = vpop.trf.xlu0 }
 0x6f8   :  { %1653 = vperm.xlu1 %2403, %v1627_v55  }
 0x6fb   :  { %v1628_v6 = vpop.trf.xlu0 }
 0x6fc   :  { %1658 = vperm.xlu1 %2403, %v1628_v6  }
 0x6ff   :  { %v1629_v60 = vpop.trf.xlu0 }
 0x700   :  { %1663 = vperm.xlu1 %2403, %v1629_v60  }
 0x703   :  { %v1630_v28 = vpop.trf.xlu0 }
 0x704   :  { %1668 = vperm.xlu1 %2403, %v1630_v28   ;;  %v1743_v28 = vmul.f32 2.0, %v3285_v12 }
 0x707   :  { %v1631_v7 = vpop.trf.xlu0 }
 0x708   :  { %1673 = vperm.xlu1 %2403, %v1631_v7  }
 0x70b   :  { %v1632_v13 = vpop.trf.xlu0 }
 0x70c   :  { %1678 = vperm.xlu1 %2403, %v1632_v13  }
 0x70f   :  { %v1633_v15 = vpop.trf.xlu0 }
 0x710   :  { %1683 = vperm.xlu0 %2404, %v1633_v15  }
 0x713   :  { %v1634_v16 = vpop.trf.xlu0 }
 0x714   :  { %1688 = vperm.xlu1 %2403, %v1634_v16  }
 0x717   :  { %v1635_v0 = vpop.trf.xlu0 }
 0x718   :  { %1693 = vperm.xlu1 %2403, %v1635_v0  }
 0x71b   :  { %v1636_v4 = vpop.trf.xlu0 }
 0x71c   :  { %1698 = vperm.xlu1 %2403, %v1636_v4  }
 0x71f   :  { %v1637_v5 = vpop.trf.xlu0 }
 0x720   :  { %1703 = vperm.xlu1 %2403, %v1637_v5  }
 0x723   :  { %v1638_v22 = vpop.trf.xlu0 }
 0x724   :  { %1708 = vperm.xlu1 %2403, %v1638_v22  }
 0x727   :  { %v1639_v17 = vpop.trf.xlu0 }
 0x728   :  { %1713 = vperm.xlu1 %2403, %v1639_v17  }
 0x72b   :  { %v1640_v18 = vpop.trf.xlu0 }
 0x72c   :  { %1718 = vperm.xlu1 %2403, %v1640_v18  }
 0x76f   :  { %v1644_v21 = vpop.permute.xlu1 %1643 }
 0x770   :  { %v1721_v26 = vadd.f32 %v1644_v21, %v3328_v59 }
 0x772   :  { %v1753_v11 = vsub.f32 %v1721_v26, %v1737_v25 }
 0x773   :  { %v1649_v29 = vpop.permute.xlu1 %1648 }
 0x774   :  { %v1769_v30 = vmax.f32 %v1753_v11, 0.0  ;;  %v1722_v32 = vadd.f32 %v1649_v29, %v3328_v59 }
 0x776   :  { %2523 = vrsqrt.f32 %v1769_v30  ;;  %v1754_v35 = vsub.f32 %v1722_v32, %v1738_v33  ;;  %vm1787_vm1 = vcmp.eq.f32.partialorder %v1769_v30, inf  ;;  %v1790_v52 = vand.u32 2147483648, %v1769_v30 }
 0x777   :  { %v1654_v3 = vpop.permute.xlu1 %1653  ;;  %vm1789_vm2 = vcmp.eq.f32.partialorder %v1769_v30, 0.0  ;;  %v1745_v32 = vmul.f32 2.0, %v3295_v14 }
 0x778   :  { %v1723_v23 = vadd.f32 %v1654_v3, %v3328_v59  ;;  %v1770_v40 = vmax.f32 %v1754_v35, 0.0 }
 0x77a   :  { %v1755_v41 = vsub.f32 %v1723_v23, %v1739_v39  ;;  %2525 = vrsqrt.f32 %v1770_v40  ;;  %vm1794_vm3 = vcmp.eq.f32.partialorder %v1770_v40, inf  ;;  %v1797_v62 = vand.u32 2147483648, %v1770_v40 }
 0x77b   :  { %v1659_v58 = vpop.permute.xlu1 %1658  ;;  %vm1796_vm4 = vcmp.eq.f32.partialorder %v1770_v40, 0.0 }
 0x77c   :  { %v1771_v20 = vmax.f32 %v1755_v41, 0.0  ;;  %v1724_v42 = vadd.f32 %v1659_v58, %v3328_v59 }
 0x77e   :  { %2527 = vrsqrt.f32 %v1771_v20  ;;  %v1756_v45 = vsub.f32 %v1724_v42, %v1740_v19  ;;  %vm1801_vm5 = vcmp.eq.f32.partialorder %v1771_v20, inf  ;;  %v1804_v5 = vand.u32 2147483648, %v1771_v20 }
 0x77f   :  { %v1664_v24 = vpop.permute.xlu1 %1663  ;;  %vm1803_vm6 = vcmp.eq.f32.partialorder %v1771_v20, 0.0 }
 0x780   :  { %v2524_v54 = vpop.eup %2523  ;;  %v1725_v47 = vadd.f32 %v1664_v24, %v3328_v59  ;;  %v1772_v51 = vmax.f32 %v1756_v45, 0.0 }
 0x781   :  { %v1786_v2 = vmul.f32 %v2524_v54, %v1769_v30 }
 0x782   :  { %v1757_v31 = vsub.f32 %v1725_v47, %v1741_v46  ;;  %2529 = vrsqrt.f32 %v1772_v51  ;;  %vm1808_vm7 = vcmp.eq.f32.partialorder %v1772_v51, inf  ;;  %v1811_v39 = vand.u32 2147483648, %v1772_v51 }
 0x783   :  { %v1788_v34 = vsel %vm1787_vm1, %v1769_v30, %v1786_v2  ;;  %v1669_v63 = vpop.permute.xlu1 %1668  ;;  %v1744_v30 = vmul.f32 2.0, %v3282_v8  ;;  %vm1810_vm8 = vcmp.eq.f32.partialorder %v1772_v51, 0.0 }
 0x784   :  { %v1791_v1 = vsel %vm1789_vm2, %v1790_v52, %v1788_v34  ;;  %v3342_v49 = vmax.f32 %v1757_v31, 0.0  ;;  %v1726_v61 = vadd.f32 %v1669_v63, %v3328_v59  ;;  %v2526_v57 = vpop.eup %2525 }
 0x785   :  { %v1897_v10 = vsub.f32 0.0, %v1791_v1  ;;  %v1793_v56 = vmul.f32 %v2526_v57, %v1770_v40  ;;  %v1746_v1 = vmul.f32 2.0, %v3292_v27  ;;  %v1747_v57 = vmul.f32 2.0, %v3305_v38 }
 0x786   :  { %2531 = vrsqrt.f32 %v3342_v49  ;;  %v1758_v55 = vsub.f32 %v1726_v61, %v1742_v53  ;;  %vm1815_vm9 = vcmp.eq.f32.partialorder %v3342_v49, inf  ;;  %v1818_v45 = vand.u32 2147483648, %v3342_v49 }
 0x787   :  { %v1914_v36 = vmul.f32 0.5, %v1897_v10  ;;  %v1674_v6 = vpop.permute.xlu1 %1673  ;;  %v1795_v7 = vsel %vm1794_vm3, %v1770_v40, %v1793_v56  ;;  %vm1817_vm10 = vcmp.eq.f32.partialorder %v3342_v49, 0.0 }
 0x788   :  { %v2528_v60 = vpop.eup %2527  ;;  %v1727_v13 = vadd.f32 %v1674_v6, %v3328_v59  ;;  %v1798_v16 = vsel %vm1796_vm4, %v1797_v62, %v1795_v7  ;;  %v3349_v9 = vmax.f32 %v1758_v55, 0.0 }
 0x789   :  { %v1930_v15 = vmul.f32 1.442695, %v1914_v36  ;;  %v1800_v0 = vmul.f32 %v2528_v60, %v1771_v20  ;;  %v1898_v4 = vsub.f32 0.0, %v1798_v16 }
 0x78a   :  { %v1759_v22 = vsub.f32 %v1727_v13, %v1743_v28  ;;  %vm1822_vm11 = vcmp.eq.f32.partialorder %v3349_v9, inf  ;;  %v1825_v27 = vand.u32 2147483648, %v3349_v9  ;;  %vm1824_vm12 = vcmp.eq.f32.partialorder %v3349_v9, 0.0 }
 0x78b   :  { %2533 = vpow2.f32 %v1930_v15  ;;  %v1802_v17 = vsel %vm1801_vm5, %v1771_v20, %v1800_v0  ;;  %v1679_v18 = vpop.permute.xlu1 %1678  ;;  %v1915_v21 = vmul.f32 0.5, %v1898_v4 }
 0x78c   :  { %v1805_v25 = vsel %vm1803_vm6, %v1804_v5, %v1802_v17  ;;  %2535 = vrsqrt.f32 %v3349_v9  ;;  %v2530_v12 = vpop.eup %2529  ;;  %v3352_v11 = vmax.f32 %v1759_v22, 0.0  ;;  %v1728_v29 = vadd.f32 %v1679_v18, %v3328_v59 }
 0x78d   :  { %v1899_v26 = vsub.f32 0.0, %v1805_v25  ;;  %v1932_v33 = vmul.f32 1.442695, %v1915_v21  ;;  %v1807_v35 = vmul.f32 %v2530_v12, %v1772_v51  ;;  %v1748_v25 = vmul.f32 2.0, %v3302_v37 }
 0x78e   :  { %2537 = vrsqrt.f32 %v3352_v11  ;;  %v1760_v58 = vsub.f32 %v1728_v29, %v1744_v30  ;;  %vm1829_vm13 = vcmp.eq.f32.partialorder %v3352_v11, inf  ;;  %v1832_v16 = vand.u32 2147483648, %v3352_v11 }
 0x78f   :  { %v1916_v3 = vmul.f32 0.5, %v1899_v26  ;;  %v1684_v23 = vpop.permute.xlu0 %1683  ;;  %2539 = vpow2.f32 %v1932_v33  ;;  %v1809_v41 = vsel %vm1808_vm7, %v1772_v51, %v1807_v35  ;;  %vm1831_vm14 = vcmp.eq.f32.partialorder %v3352_v11, 0.0 }
 0x790   :  { %v2532_v40 = vpop.eup %2531  ;;  %v1812_v42 = vsel %vm1810_vm8, %v1811_v39, %v1809_v41  ;;  %v1729_v8 = vadd.f32 %v1684_v23, %v3328_v59  ;;  %v3362_v24 = vmax.f32 %v1760_v58, 0.0  ;;  %v1749_v29 = vmul.f32 2.0, %v3315_v44 }
 0x791   :  { %v1934_v20 = vmul.f32 1.442695, %v1916_v3  ;;  %v1814_v19 = vmul.f32 %v2532_v40, %v3342_v49  ;;  %v1900_v14 = vsub.f32 0.0, %v1812_v42 }
 0x792   :  { %v1761_v46 = vsub.f32 %v1729_v8, %v1745_v32  ;;  %vm1836_vm15 = vcmp.eq.f32.partialorder %v3362_v24, inf  ;;  %v1839_v37 = vand.u32 2147483648, %v3362_v24  ;;  %vm1838_vm0 = vcmp.eq.f32.partialorder %v3362_v24, 0.0 }
 0x793   :  { %2541 = vpow2.f32 %v1934_v20  ;;  %v1816_v54 = vsel %vm1815_vm9, %v3342_v49, %v1814_v19  ;;  %v1689_v47 = vpop.permute.xlu1 %1688  ;;  %v1917_v2 = vmul.f32 0.5, %v1900_v14 }
 0x794   :  { %v1819_v51 = vsel %vm1817_vm10, %v1818_v45, %v1816_v54  ;;  %2543 = vrsqrt.f32 %v3362_v24  ;;  %v3367_v34 = vmax.f32 %v1761_v46, 0.0  ;;  %v1730_v49 = vadd.f32 %v1689_v47, %v3328_v59 }
 0x795   :  { %v2534_v52 = vpop.eup %2533  ;;  %v1901_v31 = vsub.f32 0.0, %v1819_v51  ;;  %v1936_v61 = vmul.f32 1.442695, %v1917_v2  ;;  %v1750_v2 = vmul.f32 2.0, %v3312_v43 }
 0x796   :  { %v2536_v63 = vpop.eup %2535  ;;  %1962 = vst [vmem:[%s3495_s11] sm:$0xff] %v2534_v52  ;;  %2545 = vrsqrt.f32 %v3367_v34  ;;  %v1762_v36 = vsub.f32 %v1730_v49, %v1746_v1  ;;  %vm1843_vm1 = vcmp.eq.f32.partialorder %v3367_v34, inf  ;;  %v1846_v19 = vand.u32 2147483648, %v3367_v34 }
 0x797   :  { %v1918_v53 = vmul.f32 0.5, %v1901_v31  ;;  %v1821_v10 = vmul.f32 %v2536_v63, %v3349_v9  ;;  %v1694_v56 = vpop.permute.xlu1 %1693  ;;  %2547 = vpow2.f32 %v1936_v61  ;;  %vm1845_vm2 = vcmp.eq.f32.partialorder %v3367_v34, 0.0 }
 0x798   :  { %v2538_v62 = vpop.eup %2537  ;;  %v1731_v38 = vadd.f32 %v1694_v56, %v3328_v59  ;;  %v3384_v13 = vmax.f32 %v1762_v36, 0.0  ;;  %v1751_v63 = vmul.f32 2.0, %v3324_v50 }
 0x799   :  { %v1938_v55 = vmul.f32 1.442695, %v1918_v53  ;;  %v1823_v6 = vsel %vm1822_vm11, %v3349_v9, %v1821_v10  ;;  %v2540_v60 = vpop.eup %2539  ;;  %v1828_v7 = vmul.f32 %v2538_v62, %v3352_v11 }
 0x79a   :  { %v1826_v28 = vsel %vm1824_vm12, %v1825_v27, %v1823_v6  ;;  %1963 = vst [vmem:[%s3495_s11 + $0x8] sm:$0xff] %v2540_v60  ;;  %v1763_v0 = vsub.f32 %v1731_v38, %v1747_v57  ;;  %vm1850_vm3 = vcmp.eq.f32.partialorder %v3384_v13, inf  ;;  %vm1852_vm4 = vcmp.eq.f32.partialorder %v3384_v13, 0.0 }
 0x79b   :  { %2549 = vpow2.f32 %v1938_v55  ;;  %v1902_v15 = vsub.f32 0.0, %v1826_v28  ;;  %v1699_v9 = vpop.permute.xlu1 %1698  ;;  %v1830_v4 = vsel %vm1829_vm13, %v3352_v11, %v1828_v7  ;;  %v1853_v43 = vand.u32 2147483648, %v3384_v13 }
 0x79c   :  { %2551 = vrsqrt.f32 %v3384_v13  ;;  %v1833_v17 = vsel %vm1831_vm14, %v1832_v16, %v1830_v4  ;;  %v3393_v18 = vmax.f32 %v1763_v0, 0.0  ;;  %v1732_v26 = vadd.f32 %v1699_v9, %v3328_v59 }
 0x79d   :  { %v2542_v5 = vpop.eup %2541  ;;  %v1919_v22 = vmul.f32 0.5, %v1902_v15  ;;  %v1903_v12 = vsub.f32 0.0, %v1833_v17  ;;  %v1752_v15 = vmul.f32 2.0, %v3321_v48 }
 0x79e   :  { %v2544_v21 = vpop.eup %2543  ;;  %1964 = vst [vmem:[%s3495_s11 + $0x10] sm:$0xff] %v2542_v5  ;;  %2553 = vrsqrt.f32 %v3393_v18  ;;  %v1764_v35 = vsub.f32 %v1732_v26, %v1748_v25  ;;  %vm1857_vm5 = vcmp.eq.f32.partialorder %v3393_v18, inf  ;;  %vm1859_vm6 = vcmp.eq.f32.partialorder %v3393_v18, 0.0 }
 0x79f   :  { %v1940_v11 = vmul.f32 1.442695, %v1919_v22  ;;  %v1835_v30 = vmul.f32 %v2544_v21, %v3362_v24  ;;  %v1704_v32 = vpop.permute.xlu1 %1703  ;;  %v1920_v33 = vmul.f32 0.5, %v1903_v12  ;;  %v1860_v6 = vand.u32 2147483648, %v3393_v18 }
 0x7a0   :  { %v2546_v3 = vpop.eup %2545  ;;  %v1733_v44 = vadd.f32 %v1704_v32, %v3328_v59  ;;  %v3409_v20 = vmax.f32 %v1764_v35, 0.0 }
 0x7a1   :  { %2555 = vpow2.f32 %v1940_v11  ;;  %v1837_v39 = vsel %vm1836_vm15, %v3362_v24, %v1835_v30  ;;  %v2548_v23 = vpop.eup %2547  ;;  %v1942_v40 = vmul.f32 1.442695, %v1920_v33  ;;  %v1842_v58 = vmul.f32 %v2546_v3, %v3367_v34 }
 0x7a2   :  { %v1840_v41 = vsel %vm1838_vm0, %v1839_v37, %v1837_v39  ;;  %1965 = vst [vmem:[%s3495_s11 + $0x18] sm:$0xff] %v2548_v23  ;;  %v1765_v8 = vsub.f32 %v1733_v44, %v1749_v29  ;;  %vm1864_vm7 = vcmp.eq.f32.partialorder %v3409_v20, inf  ;;  %v1867_v48 = vand.u32 2147483648, %v3409_v20 }
 0x7a3   :  { %v1904_v42 = vsub.f32 0.0, %v1840_v41  ;;  %v1709_v14 = vpop.permute.xlu1 %1708  ;;  %2557 = vpow2.f32 %v1942_v40  ;;  %v1844_v45 = vsel %vm1843_vm1, %v3367_v34, %v1842_v58  ;;  %vm1866_vm8 = vcmp.eq.f32.partialorder %v3409_v20, 0.0 }
 0x7a4   :  { %v1847_v46 = vsel %vm1845_vm2, %v1846_v19, %v1844_v45  ;;  %2559 = vrsqrt.f32 %v3409_v20  ;;  %v3423_v52 = vmax.f32 %v1765_v8, 0.0  ;;  %v1734_v31 = vadd.f32 %v1709_v14, %v3328_v59 }
 0x7a5   :  { %v2550_v24 = vpop.eup %2549  ;;  %v1921_v54 = vmul.f32 0.5, %v1904_v42  ;;  %v1905_v51 = vsub.f32 0.0, %v1847_v46 }
 0x7a6   :  { %v2552_v47 = vpop.eup %2551  ;;  %1966 = vst [vmem:[%s3495_s11 + $0x20] sm:$0xff] %v2550_v24  ;;  %2561 = vrsqrt.f32 %v3423_v52  ;;  %v1766_v50 = vsub.f32 %v1734_v31, %v1750_v2  ;;  %vm1871_vm9 = vcmp.eq.f32.partialorder %v3423_v52, inf  ;;  %v1874_v37 = vand.u32 2147483648, %v3423_v52 }
 0x7a7   :  { %v1944_v34 = vmul.f32 1.442695, %v1921_v54  ;;  %v1849_v1 = vmul.f32 %v2552_v47, %v3384_v13  ;;  %v1714_v61 = vpop.permute.xlu1 %1713  ;;  %v1922_v49 = vmul.f32 0.5, %v1905_v51  ;;  %vm1873_vm10 = vcmp.eq.f32.partialorder %v3423_v52, 0.0 }
 0x7a8   :  { %v2554_v57 = vpop.eup %2553  ;;  %v1735_v36 = vadd.f32 %v1714_v61, %v3328_v59  ;;  %v1782_v38 = vmax.f32 %v1766_v50, 0.0 }
 0x7a9   :  { %2563 = vpow2.f32 %v1944_v34  ;;  %v1851_v53 = vsel %vm1850_vm3, %v3384_v13, %v1849_v1  ;;  %v1946_v10 = vmul.f32 1.442695, %v1922_v49  ;;  %v1856_v27 = vmul.f32 %v2554_v57, %v3393_v18 }
 0x7aa   :  { %v1854_v56 = vsel %vm1852_vm4, %v1853_v43, %v1851_v53  ;;  %v1767_v7 = vsub.f32 %v1735_v36, %v1751_v63  ;;  %vm1878_vm11 = vcmp.eq.f32.partialorder %v1782_v38, inf  ;;  %v1881_v42 = vand.u32 2147483648, %v1782_v38 }
 0x7ab   :  { %v2556_v62 = vpop.eup %2555  ;;  %v1906_v55 = vsub.f32 0.0, %v1854_v56  ;;  %v1719_v60 = vpop.permute.xlu1 %1718  ;;  %2565 = vpow2.f32 %v1946_v10  ;;  %v1858_v28 = vsel %vm1857_vm5, %v3393_v18, %v1856_v27  ;;  %vm1880_vm12 = vcmp.eq.f32.partialorder %v1782_v38, 0.0 }
 0x7ac   :  { %1967 = vst [vmem:[%s3495_s11 + $0x28] sm:$0xff] %v2556_v62  ;;  %v1736_v13 = vadd.f32 %v1719_v60, %v3328_v59  ;;  %v1861_v0 = vsel %vm1859_vm6, %v1860_v6, %v1858_v28  ;;  %2567 = vrsqrt.f32 %v1782_v38  ;;  %v1783_v5 = vmax.f32 %v1767_v7, 0.0 }
 0x7ad   :  { %v1923_v16 = vmul.f32 0.5, %v1906_v55  ;;  %v2558_v9 = vpop.eup %2557  ;;  %v1907_v4 = vsub.f32 0.0, %v1861_v0 }
 0x7ae   :  { %v2560_v22 = vpop.eup %2559  ;;  %1968 = vst [vmem:[%s3495_s11 + $0x30] sm:$0xff] %v2558_v9  ;;  %v1768_v21 = vsub.f32 %v1736_v13, %v1752_v15  ;;  %2569 = vrsqrt.f32 %v1783_v5  ;;  %vm1885_vm13 = vcmp.eq.f32.partialorder %v1783_v5, inf  ;;  %v1888_v47 = vand.u32 2147483648, %v1783_v5 }
 0x7af   :  { %v1948_v17 = vmul.f32 1.442695, %v1923_v16  ;;  %v1924_v25 = vmul.f32 0.5, %v1907_v4  ;;  %v1863_v18 = vmul.f32 %v2560_v22, %v3409_v20  ;;  %vm1887_vm14 = vcmp.eq.f32.partialorder %v1783_v5, 0.0 }
 0x7b0   :  { %v1784_v59 = vmax.f32 %v1768_v21, 0.0  ;;  %v2562_v12 = vpop.eup %2561 }
 0x7b1   :  { %2571 = vpow2.f32 %v1948_v17  ;;  %v1950_v26 = vmul.f32 1.442695, %v1924_v25  ;;  %v1865_v29 = vsel %vm1864_vm7, %v3409_v20, %v1863_v18  ;;  %v1870_v32 = vmul.f32 %v2562_v12, %v3423_v52 }
 0x7b2   :  { %v1868_v30 = vsel %vm1866_vm8, %v1867_v48, %v1865_v29  ;;  %2573 = vrsqrt.f32 %v1784_v59  ;;  %vm1892_vm15 = vcmp.eq.f32.partialorder %v1784_v59, inf  ;;  %v1895_v61 = vand.u32 2147483648, %v1784_v59 }
 0x7b3   :  { %v2564_v11 = vpop.eup %2563  ;;  %2575 = vpow2.f32 %v1950_v26  ;;  %v1908_v33 = vsub.f32 0.0, %v1868_v30  ;;  %v1872_v35 = vsel %vm1871_vm9, %v3423_v52, %v1870_v32  ;;  %vm1894_vm0 = vcmp.eq.f32.partialorder %v1784_v59, 0.0 }
 0x7b4   :  { %1969 = vst [vmem:[%s3495_s11 + $0x38] sm:$0xff] %v2564_v11  ;;  %v1875_v44 = vsel %vm1873_vm10, %v1874_v37, %v1872_v35 }
 0x7b5   :  { %v2566_v3 = vpop.eup %2565  ;;  %v1925_v39 = vmul.f32 0.5, %v1908_v33  ;;  %v1909_v40 = vsub.f32 0.0, %v1875_v44 }
 0x7b6   :  { %v2568_v23 = vpop.eup %2567  ;;  %1970 = vst [vmem:[%s3495_s11 + $0x40] sm:$0xff] %v2566_v3 }
 0x7b7   :  { %v1952_v41 = vmul.f32 1.442695, %v1925_v39  ;;  %v1877_v58 = vmul.f32 %v2568_v23, %v1782_v38  ;;  %v1926_v20 = vmul.f32 0.5, %v1909_v40 }
 0x7b8   :  { %v2570_v19 = vpop.eup %2569 }
 0x7b9   :  { %2577 = vpow2.f32 %v1952_v41  ;;  %v1879_v8 = vsel %vm1878_vm11, %v1782_v38, %v1877_v58  ;;  %v1954_v45 = vmul.f32 1.442695, %v1926_v20  ;;  %v1884_v54 = vmul.f32 %v2570_v19, %v1783_v5 }
 0x7ba   :  { %v1882_v24 = vsel %vm1880_vm12, %v1881_v42, %v1879_v8 }
 0x7bb   :  { %v2572_v14 = vpop.eup %2571  ;;  %v1910_v46 = vsub.f32 0.0, %v1882_v24  ;;  %2579 = vpow2.f32 %v1954_v45  ;;  %v1886_v51 = vsel %vm1885_vm13, %v1783_v5, %v1884_v54 }
 0x7bc   :  { %1971 = vst [vmem:[%s3495_s11 + $0x48] sm:$0xff] %v2572_v14  ;;  %v2574_v2 = vpop.eup %2573  ;;  %v1889_v63 = vsel %vm1887_vm14, %v1888_v47, %v1886_v51 }
 0x7bd   :  { %v2576_v52 = vpop.eup %2575  ;;  %v1927_v31 = vmul.f32 0.5, %v1910_v46  ;;  %v1891_v34 = vmul.f32 %v2574_v2, %v1784_v59  ;;  %v1911_v1 = vsub.f32 0.0, %v1889_v63 }
 0x7be   :  { %1972 = vst [vmem:[%s3495_s11 + $0x50] sm:$0xff] %v2576_v52 }
 0x7bf   :  { %v1956_v49 = vmul.f32 1.442695, %v1927_v31  ;;  %v1893_v43 = vsel %vm1892_vm15, %v1784_v59, %v1891_v34  ;;  %v1928_v57 = vmul.f32 0.5, %v1911_v1 }
 0x7c0   :  { %v1896_v53 = vsel %vm1894_vm0, %v1895_v61, %v1893_v43 }
 0x7c1   :  { %2581 = vpow2.f32 %v1956_v49  ;;  %v1912_v50 = vsub.f32 0.0, %v1896_v53  ;;  %v1958_v10 = vmul.f32 1.442695, %v1928_v57 }
 0x7c3   :  { %v2578_v56 = vpop.eup %2577  ;;  %v1929_v27 = vmul.f32 0.5, %v1912_v50  ;;  %2583 = vpow2.f32 %v1958_v10 }
 0x7c4   :  { %1973 = vst [vmem:[%s3495_s11 + $0x58] sm:$0xff] %v2578_v56 }
 0x7c5   :  { %v1960_v36 = vmul.f32 1.442695, %v1929_v27  ;;  %v2580_v62 = vpop.eup %2579 }
 0x7c6   :  { %1974 = vst [vmem:[%s3495_s11 + $0x60] sm:$0xff] %v2580_v62 }
 0x7c7   :  { %2585 = vpow2.f32 %v1960_v36 }
 0x7cb   :  { %v2582_v55 = vpop.eup %2581 }
 0x7cc   :  { %1975 = vst [vmem:[%s3495_s11 + $0x68] sm:$0xff] %v2582_v55 }
 0x7cd   :  { %v2584_v6 = vpop.eup %2583 }
 0x7ce   :  { %1976 = vst [vmem:[%s3495_s11 + $0x70] sm:$0xff] %v2584_v6 }
 0x7d1   :  { %v2586_v38 = vpop.eup %2585 }
 0x7d2   :  { %1977 = vst [vmem:[%s3495_s11 + $0x78] sm:$0xff] %v2586_v38 }
 0x7d3   :  { %2002 = vsyncpa [#allocation3], 1 }
 0x7d4   :  { %2003 = vsyncpa [#allocation5], 1 }

</bundles_post_ra>
